<compile_context>
chip_gen: v6e
topology: v6e:2x2x1
jax: 0.10.0
libtpu: 0.0.40
codegen_flags: <defaults>
</compile_context>

<pallas_src>
import math

import jax
import jax.numpy as jnp
from jax.experimental import pallas as pl
from jax.experimental.pallas import tpu as pltpu


def _round_up(x, m):
    return ((x + m - 1) // m) * m


# ------------------------------------------------------------------
# Fused kernel: hypernet MLP -> (W^T, bias) in VMEM -> BatchLinear + LN + Tanh
# ------------------------------------------------------------------
def _make_fused_kernel(n_layers, in_ch, out_ch, out_ch_p, matmul_dtype, hin_3d):
    nwp = in_ch * out_ch_p
    inv_n = 1.0 / float(out_ch)          # LN statistics over the REAL channels

    def kernel(hin_ref, *refs):
        w_refs = refs[:n_layers]
        b_refs = refs[n_layers:2 * n_layers]
        x_ref = refs[2 * n_layers]
        o_ref = refs[2 * n_layers + 1]

        # ---- Phase 1: hypernetwork MLP (FCBlock, outermost layer linear) ----
        h = hin_ref[...]
        if hin_3d:
            h = h[:, 0, :]
        h = h.astype(jnp.float32)                                 # (bt, hyper_in_ch)
        for i in range(n_layers):
            a, w = h, w_refs[i][...]
            # bf16 only for the hidden layers; the LAST layer (which emits the
            # predicted W/bias) stays f32 so precision loss in the predicted
            # weights does not compound through Phase 2.
            if matmul_dtype is not None and i < n_layers - 1:
                a = a.astype(matmul_dtype)
                w = w.astype(matmul_dtype)
            h = jnp.dot(a, w, preferred_element_type=jnp.float32)
            h = h + b_refs[i][...].astype(jnp.float32)
            if i < n_layers - 1:                                  # FCLayer = Linear + Tanh
                h = jnp.tanh(h)

        # Flat params are already W^T in (in_ch, out_ch_p) row-major: the
        # columns of the last hypernet layer were permuted (and zero-padded for
        # o >= out_ch) at init. out_ch_p % 128 == 0 -> clean lane-boundary
        # reshape, no XLU relayout, no in-kernel transpose.
        bt = h.shape[0]
        w_t = h[:, :nwp].reshape(bt, in_ch, out_ch_p)             # (bt, in_ch, out_ch_p)
        bias = h[:, nwp:nwp + out_ch_p]                           # (bt, out_ch_p)

        # ---- Phase 2: BatchLinear + LayerNorm(no affine) + Tanh ----
        x = x_ref[...]                                            # (bt, N, in_ch)
        if matmul_dtype is not None:
            xa = x.astype(matmul_dtype)
            wa = w_t.astype(matmul_dtype)
        else:
            xa = x.astype(jnp.float32)
            wa = w_t
        y = jnp.einsum('bni,bio->bno', xa, wa,
                       preferred_element_type=jnp.float32)        # (bt, N, out_ch_p)
        y = y + bias[:, None, :]                                  # bias BEFORE LayerNorm

        # One-pass LN statistics. Padded lanes are exactly zero (zero W columns
        # + zero bias), so sums over out_ch_p lanes equal sums over the real
        # out_ch channels; divisor is the real out_ch.
        s1 = jnp.sum(y, axis=-1, keepdims=True)
        s2 = jnp.sum(y * y, axis=-1, keepdims=True)
        mean = s1 * inv_n
        var = jnp.maximum(s2 * inv_n - mean * mean, 0.0)
        y = (y - mean) * jax.lax.rsqrt(var + 1e-5)                # eps=1e-5 (PyTorch default)
        o_ref[...] = jnp.tanh(y).astype(o_ref.dtype)

    return kernel


# ------------------------------------------------------------------
# HyperLayer: parameter construction + fused forward
# ------------------------------------------------------------------
class HyperLayerPallas:
    def __init__(self, key, in_ch, out_ch, hyper_in_ch,
                 hyper_num_hidden_layers, hyper_hidden_ch,
                 block_b=32, matmul_dtype=None, out_dtype=jnp.float32,
                 pad_out_lanes=True):
        """block_b: max batch elements per grid step (further capped by VMEM).
        matmul_dtype: e.g. jnp.bfloat16 (MXU operands + bf16 x storage); None = f32.
        pad_out_lanes: pad out_ch to a multiple of 128 for lane-dense stores."""
        self.in_ch = in_ch
        self.out_ch = out_ch
        self.block_b = int(block_b)
        self.matmul_dtype = matmul_dtype
        self.out_dtype = out_dtype
        self.out_ch_p = _round_up(out_ch, 128) if pad_out_lanes else out_ch

        # FCBlock dims: FCLayer(in,hid), num_hidden x FCLayer(hid,hid), Linear(hid, P)
        P = in_ch * out_ch + out_ch
        dims = [hyper_in_ch] + [hyper_hidden_ch] * (hyper_num_hidden_layers + 1) + [P]
        self.weights, self.biases = [], []       # PyTorch-equivalent layout (d_in, d_out)
        for i in range(len(dims) - 1):
            key, kw, kb = jax.random.split(key, 3)
            fan_in, fan_out = dims[i], dims[i + 1]
            # kaiming_normal_(a=0, leaky_relu, fan_in): std = sqrt(2/fan_in)
            w = jax.random.normal(kw, (fan_in, fan_out), jnp.float32) * math.sqrt(2.0 / fan_in)
            if i == len(dims) - 2:
                w = w * 0.1                       # last_hyper_layer_init
            # nn.Linear default bias init: U(-1/sqrt(fan_in), 1/sqrt(fan_in))
            bound = 1.0 / math.sqrt(fan_in)
            b = jax.random.uniform(kb, (1, fan_out), jnp.float32, -bound, bound)
            self.weights.append(w)
            self.biases.append(b)

        # Kernel-side last layer: permute + zero-pad columns (weight AND bias
        # consistently) so flat param column i*out_ch_p + o holds PyTorch's
        # o*in_ch + i, i.e. the flat params are W^T in (in_ch, out_ch_p)
        # row-major with padded output channels (o >= out_ch) exactly zero.
        # One-time, init-side; preserves numerics and makes stores lane-dense.
        nw, ocp = in_ch * out_ch, self.out_ch_p
        nwp = in_ch * ocp
        q = jnp.arange(nwp)
        o_idx, i_idx = q % ocp, q // ocp
        src = jnp.concatenate([
            jnp.where(o_idx < out_ch, o_idx * in_ch + i_idx, 0),
            jnp.where(jnp.arange(ocp) < out_ch, nw + jnp.arange(ocp), 0)])
        valid = jnp.concatenate([o_idx < out_ch, jnp.arange(ocp) < out_ch])
        self._k_weights = list(self.weights)
        self._k_biases = list(self.biases)
        self._k_weights[-1] = jnp.where(valid[None, :], self.weights[-1][:, src], 0.0)
        self._k_biases[-1] = jnp.where(valid[None, :], self.biases[-1][:, src], 0.0)

        # Generation-aware VMEM limit: default scoped limits (16/32/32 MiB) are
        # far below physical (128/128/64 MiB on v5e/v6e/v7x); leave headroom.
        try:
            cap = int(pltpu.get_tpu_info().vmem_capacity_bytes)
        except Exception:
            cap = 64 << 20                        # safe on every generation
        self._vmem_limit = int(min(cap - (8 << 20), int(cap * 0.85)))

        self._weight_bytes = 4 * sum(int(w.size) + int(b.size)
                                     for w, b in zip(self._k_weights, self._k_biases))
        self._use_buffered1 = hasattr(pl, "Buffered")

    def _pick_bt(self, B, N):
        """Largest batch tile that fits the VMEM budget (pipelined blocks
        double-buffered + live f32 intermediates), capped at block_b. Returns
        either bt == B (single tile) or a multiple of 8 (layout-clean blocks)."""
        x_isz = jnp.dtype(self.matmul_dtype).itemsize if self.matmul_dtype is not None else 4
        o_isz = jnp.dtype(self.out_dtype).itemsize
        hic = self.weights[0].shape[0]
        hid = max(w.shape[1] for w in self.weights[:-1])
        P_pad = self.in_ch * self.out_ch_p + self.out_ch_p
        per_row = (2 * N * self.in_ch * x_isz              # x block (double-buffered)
                   + 2 * N * self.out_ch_p * o_isz         # out block (double-buffered)
                   + 2 * hic * 4                           # hyper_input block
                   + 4 * (P_pad + hid)                     # Phase-1 live activations (f32)
                   + 2 * 4 * N * (self.in_ch + self.out_ch_p))  # Phase-2 live f32 tensors
        budget = int(self._vmem_limit * 0.7) - 2 * self._weight_bytes
        cap = max(1, budget // per_row)
        cap = min(int(cap), self.block_b)
        if B <= cap:
            return B
        return max(8, (cap // 8) * 8) if cap >= 8 else int(cap)

    def __call__(self, hyper_input, x):
        """hyper_input: (B, hyper_in_ch);  x: (B, N, in_ch) -> (B, N, out_ch)."""
        B, hyper_in_ch = hyper_input.shape
        _, N, in_ch = x.shape
        assert x.shape[0] == B and in_ch == self.in_ch
        out_ch, out_ch_p = self.out_ch, self.out_ch_p
        n_layers = len(self._k_weights)

        bt = self._pick_bt(B, N)
        B_pad = _round_up(B, bt)
        grid = (B_pad // bt,)
        # TODO(synk): if B_pad // bt == 1 on v7x, add a second "parallel" grid
        # axis over N tiles so both TensorCores get work (irrelevant at small B).

        # bf16 HBM storage for x when bf16 MXU operands are requested
        # (halves the dominant input DMA traffic on the mem-bound path).
        if self.matmul_dtype is not None:
            x = x.astype(self.matmul_dtype)
        hin = hyper_input.astype(jnp.float32)
        if B_pad != B:
            hin = jnp.pad(hin, ((0, B_pad - B), (0, 0)))
            x = jnp.pad(x, ((0, B_pad - B), (0, 0), (0, 0)))

        # 2-D hyper_input blocks are layout-clean iff bt == B_pad or bt % 8 == 0;
        # otherwise fall back to a (bt, 1, hyper_in_ch) 3-D block.
        hin_3d = (bt != B_pad) and (bt % 8 != 0)
        if hin_3d:
            hin = hin.reshape(B_pad, 1, hyper_in_ch)

        kernel = _make_fused_kernel(n_layers, in_ch, out_ch, out_ch_p,
                                    self.matmul_dtype, hin_3d)

        def build_specs(single_buffer_weights):
            if hin_3d:
                in_specs = [pl.BlockSpec((bt, 1, hyper_in_ch), lambda g: (g, 0, 0))]
            else:
                in_specs = [pl.BlockSpec((bt, hyper_in_ch), lambda g: (g, 0))]
            # Hypernet weights/biases: constant index_map -> fetched once; single
            # buffering frees the wasted second copy of the large last-layer weight.
            wkw = ({"pipeline_mode": pl.Buffered(1)} if single_buffer_weights else {})
            for w in self._k_weights:
                in_specs.append(pl.BlockSpec(w.shape, lambda g: (0, 0), **wkw))
            for b in self._k_biases:
                in_specs.append(pl.BlockSpec(b.shape, lambda g: (0, 0), **wkw))
            in_specs.append(pl.BlockSpec((bt, N, in_ch), lambda g: (g, 0, 0)))
            out_specs = pl.BlockSpec((bt, N, out_ch_p), lambda g: (g, 0, 0))
            return in_specs, out_specs

        def run(single_buffer_weights):
            in_specs, out_specs = build_specs(single_buffer_weights)
            fn = pl.pallas_call(
                kernel,
                out_shape=jax.ShapeDtypeStruct((B_pad, N, out_ch_p), self.out_dtype),
                grid=grid,
                in_specs=in_specs,
                out_specs=out_specs,
                compiler_params=pltpu.CompilerParams(
                    dimension_semantics=("parallel",),
                    vmem_limit_bytes=self._vmem_limit),
            )
            out = fn(hin, *self._k_weights, *self._k_biases, x)
            return jax.block_until_ready(out)

        if self._use_buffered1:
            try:
                out_full = run(True)
            except Exception:
                self._use_buffered1 = False       # fall back to default double-buffering
                out_full = run(False)
        else:
            out_full = run(False)

        return out_full[:B, :, :out_ch]


# ------------------------------------------------------------------
# Plain-JAX reference (mirrors the PyTorch module exactly, original layouts)
# ------------------------------------------------------------------
def hyper_layer_reference(hyper_input, x, weights, biases, in_ch, out_ch):
    h = hyper_input
    n = len(weights)
    for i in range(n):
        h = h @ weights[i] + biases[i]
        if i < n - 1:
            h = jnp.tanh(h)
    nw = in_ch * out_ch
    B = h.shape[0]
    W = h[:, :nw].reshape(B, out_ch, in_ch)            # PyTorch (out_ch, in_ch)
    b = h[:, nw:nw + out_ch].reshape(B, 1, out_ch)
    y = jnp.einsum('bni,boi->bno', x, W) + b           # x @ W^T + bias
    mean = jnp.mean(y, axis=-1, keepdims=True)
    var = jnp.mean((y - mean) ** 2, axis=-1, keepdims=True)
    y = (y - mean) / jnp.sqrt(var + 1e-5)
    return jnp.tanh(y)


if __name__ == "__main__":
    key = jax.random.PRNGKey(0)
    B, N = 2, 8
    in_ch, out_ch = 32, 32
    hyper_in_ch, hyper_hidden_ch, hyper_num_hidden_layers = 8, 32, 1

    key, k_model, k_h, k_x = jax.random.split(key, 4)
    hyper_input = jax.random.normal(k_h, (B, hyper_in_ch), jnp.float32)
    x = jax.random.normal(k_x, (B, N, in_ch), jnp.float32)

    # f32 path: exact reference numerics.
    model = HyperLayerPallas(k_model, in_ch, out_ch, hyper_in_ch,
                             hyper_num_hidden_layers, hyper_hidden_ch,
                             matmul_dtype=None)
    out = model(hyper_input, x)
    jax.block_until_ready(out)
    assert out.shape == (B, N, out_ch), out.shape
    assert bool(jnp.all(jnp.isfinite(out)))

    ref = hyper_layer_reference(hyper_input, x, model.weights, model.biases, in_ch, out_ch)
    assert bool(jnp.allclose(out, ref, atol=1e-2, rtol=1e-2)), \
        float(jnp.max(jnp.abs(out - ref)))

    # bf16 MXU-operand + bf16 x-storage path (recommended on v5e/v6e/v7x).
    model_bf16 = HyperLayerPallas(k_model, in_ch, out_ch, hyper_in_ch,
                                  hyper_num_hidden_layers, hyper_hidden_ch,
                                  matmul_dtype=jnp.bfloat16)
    out_bf16 = model_bf16(hyper_input, x)
    jax.block_until_ready(out_bf16)
    assert out_bf16.shape == (B, N, out_ch)
    assert bool(jnp.all(jnp.isfinite(out_bf16)))
    assert bool(jnp.allclose(out_bf16, ref, atol=1e-1, rtol=1e-1)), \
        float(jnp.max(jnp.abs(out_bf16 - ref)))

    print("KERNEL_OK")
</pallas_src>

<mosaic_0001>
module attributes {stable_mosaic.version = 11 : i64} {
  func.func @kernel(%arg0: i32, %arg1: memref<2x8xf32, #tpu.memory_space<vmem>>, %arg2: memref<8x32xf32, #tpu.memory_space<vmem>>, %arg3: memref<32x32xf32, #tpu.memory_space<vmem>>, %arg4: memref<32x4224xf32, #tpu.memory_space<vmem>>, %arg5: memref<1x32xf32, #tpu.memory_space<vmem>>, %arg6: memref<1x32xf32, #tpu.memory_space<vmem>>, %arg7: memref<1x4224xf32, #tpu.memory_space<vmem>>, %arg8: memref<2x8x32xf32, #tpu.memory_space<vmem>>, %arg9: memref<2x8x128xf32, #tpu.memory_space<vmem>>) attributes {dimension_semantics = [#tpu.dimension_semantics<parallel>], iteration_bounds = array<i64: 1>, scalar_prefetch = 0 : i64, scratch_operands = 0 : i64, tpu.core_type = #tpu.core_type<tc>, window_params = [{transform_indices = @transform_0, window_bounds = array<i64: 2, 8>}, {pipeline_mode = #tpu.pipeline_mode<synchronous>, transform_indices = @transform_1, window_bounds = array<i64: 8, 32>}, {pipeline_mode = #tpu.pipeline_mode<synchronous>, transform_indices = @transform_2, window_bounds = array<i64: 32, 32>}, {pipeline_mode = #tpu.pipeline_mode<synchronous>, transform_indices = @transform_3, window_bounds = array<i64: 32, 4224>}, {pipeline_mode = #tpu.pipeline_mode<synchronous>, transform_indices = @transform_4, window_bounds = array<i64: 1, 32>}, {pipeline_mode = #tpu.pipeline_mode<synchronous>, transform_indices = @transform_5, window_bounds = array<i64: 1, 32>}, {pipeline_mode = #tpu.pipeline_mode<synchronous>, transform_indices = @transform_6, window_bounds = array<i64: 1, 4224>}, {transform_indices = @transform_7, window_bounds = array<i64: 2, 8, 32>}, {transform_indices = @transform_8, window_bounds = array<i64: 2, 8, 128>}]} {
    %c0 = arith.constant 0 : index
    %c0_0 = arith.constant 0 : index
    %0 = vector.load %arg1[%c0, %c0_0] : memref<2x8xf32, #tpu.memory_space<vmem>>, vector<2x8xf32>
    %c0_1 = arith.constant 0 : index
    %c0_2 = arith.constant 0 : index
    %1 = vector.load %arg2[%c0_1, %c0_2] : memref<8x32xf32, #tpu.memory_space<vmem>>, vector<8x32xf32>
    %cst = arith.constant dense<0.000000e+00> : vector<2x32xf32>
    %2 = tpu.matmul %0, %1, %cst {dimension_numbers = #tpu.dot_dimension_numbers<[1], [0], [0], [1], [0, 0, 1, 1], [], []>} : vector<2x8xf32>, vector<8x32xf32>, vector<2x32xf32> -> vector<2x32xf32>
    %c0_3 = arith.constant 0 : index
    %c0_4 = arith.constant 0 : index
    %3 = vector.load %arg5[%c0_3, %c0_4] : memref<1x32xf32, #tpu.memory_space<vmem>>, vector<1x32xf32>
    %4 = vector.broadcast %3 : vector<1x32xf32> to vector<2x32xf32>
    %5 = arith.addf %2, %4 : vector<2x32xf32>
    %6 = math.tanh %5 : vector<2x32xf32>
    %c0_5 = arith.constant 0 : index
    %c0_6 = arith.constant 0 : index
    %7 = vector.load %arg3[%c0_5, %c0_6] : memref<32x32xf32, #tpu.memory_space<vmem>>, vector<32x32xf32>
    %cst_7 = arith.constant dense<0.000000e+00> : vector<2x32xf32>
    %8 = tpu.matmul %6, %7, %cst_7 {dimension_numbers = #tpu.dot_dimension_numbers<[1], [0], [0], [1], [0, 0, 1, 1], [], []>} : vector<2x32xf32>, vector<32x32xf32>, vector<2x32xf32> -> vector<2x32xf32>
    %c0_8 = arith.constant 0 : index
    %c0_9 = arith.constant 0 : index
    %9 = vector.load %arg6[%c0_8, %c0_9] : memref<1x32xf32, #tpu.memory_space<vmem>>, vector<1x32xf32>
    %10 = vector.broadcast %9 : vector<1x32xf32> to vector<2x32xf32>
    %11 = arith.addf %8, %10 : vector<2x32xf32>
    %12 = math.tanh %11 : vector<2x32xf32>
    %c0_10 = arith.constant 0 : index
    %c0_11 = arith.constant 0 : index
    %13 = vector.load %arg4[%c0_10, %c0_11] : memref<32x4224xf32, #tpu.memory_space<vmem>>, vector<32x4224xf32>
    %cst_12 = arith.constant dense<0.000000e+00> : vector<2x4224xf32>
    %14 = tpu.matmul %12, %13, %cst_12 {dimension_numbers = #tpu.dot_dimension_numbers<[1], [0], [0], [1], [0, 0, 1, 1], [], []>} : vector<2x32xf32>, vector<32x4224xf32>, vector<2x4224xf32> -> vector<2x4224xf32>
    %c0_13 = arith.constant 0 : index
    %c0_14 = arith.constant 0 : index
    %15 = vector.load %arg7[%c0_13, %c0_14] : memref<1x4224xf32, #tpu.memory_space<vmem>>, vector<1x4224xf32>
    %16 = vector.broadcast %15 : vector<1x4224xf32> to vector<2x4224xf32>
    %17 = arith.addf %14, %16 : vector<2x4224xf32>
    %18 = vector.extract_strided_slice %17 {offsets = [0, 0], sizes = [2, 4096], strides = [1, 1]} : vector<2x4224xf32> to vector<2x4096xf32>
    %19 = vector.shape_cast %18 : vector<2x4096xf32> to vector<2x32x128xf32>
    %20 = vector.extract_strided_slice %17 {offsets = [0, 4096], sizes = [2, 128], strides = [1, 1]} : vector<2x4224xf32> to vector<2x128xf32>
    %c0_15 = arith.constant 0 : index
    %c0_16 = arith.constant 0 : index
    %c0_17 = arith.constant 0 : index
    %21 = vector.load %arg8[%c0_15, %c0_16, %c0_17] : memref<2x8x32xf32, #tpu.memory_space<vmem>>, vector<2x8x32xf32>
    "tpu.trace_start"() <{level = 10 : i32, message = "bni,bio->bno"}> : () -> ()
    %cst_18 = arith.constant dense<0.000000e+00> : vector<2x8x128xf32>
    %22 = tpu.matmul %21, %19, %cst_18 {dimension_numbers = #tpu.dot_dimension_numbers<[2], [1], [1], [2], [0, 0, 0, 1, 1, 2], [0], [0]>} : vector<2x8x32xf32>, vector<2x32x128xf32>, vector<2x8x128xf32> -> vector<2x8x128xf32>
    "tpu.trace_stop"() : () -> ()
    %23 = vector.shape_cast %20 : vector<2x128xf32> to vector<2x1x128xf32>
    %24 = vector.broadcast %23 : vector<2x1x128xf32> to vector<2x8x128xf32>
    %25 = arith.addf %22, %24 : vector<2x8x128xf32>
    %cst_19 = arith.constant dense<0.000000e+00> : vector<2x8xf32>
    %26 = vector.multi_reduction <add>, %25, %cst_19 [2] : vector<2x8x128xf32> to vector<2x8xf32>
    %27 = vector.shape_cast %26 : vector<2x8xf32> to vector<2x8x1xf32>
    %28 = arith.mulf %25, %25 : vector<2x8x128xf32>
    %cst_20 = arith.constant dense<0.000000e+00> : vector<2x8xf32>
    %29 = vector.multi_reduction <add>, %28, %cst_20 [2] : vector<2x8x128xf32> to vector<2x8xf32>
    %30 = vector.shape_cast %29 : vector<2x8xf32> to vector<2x8x1xf32>
    %cst_21 = arith.constant 3.125000e-02 : f32
    %31 = vector.broadcast %cst_21 : f32 to vector<2x8x1xf32>
    %32 = arith.mulf %27, %31 : vector<2x8x1xf32>
    %cst_22 = arith.constant 3.125000e-02 : f32
    %33 = vector.broadcast %cst_22 : f32 to vector<2x8x1xf32>
    %34 = arith.mulf %30, %33 : vector<2x8x1xf32>
    %35 = arith.mulf %32, %32 : vector<2x8x1xf32>
    %36 = arith.subf %34, %35 : vector<2x8x1xf32>
    %cst_23 = arith.constant 0.000000e+00 : f32
    %37 = vector.broadcast %cst_23 : f32 to vector<2x8x1xf32>
    %38 = arith.maximumf %36, %37 : vector<2x8x1xf32>
    %39 = vector.broadcast %32 : vector<2x8x1xf32> to vector<2x8x128xf32>
    %40 = arith.subf %25, %39 : vector<2x8x128xf32>
    %cst_24 = arith.constant 9.99999974E-6 : f32
    %41 = vector.broadcast %cst_24 : f32 to vector<2x8x1xf32>
    %42 = arith.addf %38, %41 : vector<2x8x1xf32>
    %43 = math.rsqrt %42 : vector<2x8x1xf32>
    %44 = vector.broadcast %43 : vector<2x8x1xf32> to vector<2x8x128xf32>
    %45 = arith.mulf %40, %44 : vector<2x8x128xf32>
    %46 = math.tanh %45 : vector<2x8x128xf32>
    %c0_25 = arith.constant 0 : index
    %c0_26 = arith.constant 0 : index
    %c0_27 = arith.constant 0 : index
    %47 = vector.load %arg9[%c0_25, %c0_26, %c0_27] : memref<2x8x128xf32, #tpu.memory_space<vmem>>, vector<2x8x128xf32>
    tpu.vector_store %arg9[%c0_25, %c0_26, %c0_27], %46 {strides = array<i32>} : memref<2x8x128xf32, #tpu.memory_space<vmem>>, vector<2x8x128xf32>,
    return
  }
  func.func @transform_0(%arg0: i32) -> (i32, i32) {
    %c0_i32 = arith.constant 0 : i32
    %c0_i32_0 = arith.constant 0 : i32
    return %arg0, %c0_i32 : i32, i32
  }
  func.func @transform_1(%arg0: i32) -> (i32, i32) {
    %c0_i32 = arith.constant 0 : i32
    %c0_i32_0 = arith.constant 0 : i32
    %c0_i32_1 = arith.constant 0 : i32
    return %c0_i32, %c0_i32_0 : i32, i32
  }
  func.func @transform_2(%arg0: i32) -> (i32, i32) {
    %c0_i32 = arith.constant 0 : i32
    %c0_i32_0 = arith.constant 0 : i32
    %c0_i32_1 = arith.constant 0 : i32
    return %c0_i32, %c0_i32_0 : i32, i32
  }
  func.func @transform_3(%arg0: i32) -> (i32, i32) {
    %c0_i32 = arith.constant 0 : i32
    %c0_i32_0 = arith.constant 0 : i32
    %c0_i32_1 = arith.constant 0 : i32
    return %c0_i32, %c0_i32_0 : i32, i32
  }
  func.func @transform_4(%arg0: i32) -> (i32, i32) {
    %c0_i32 = arith.constant 0 : i32
    %c0_i32_0 = arith.constant 0 : i32
    %c0_i32_1 = arith.constant 0 : i32
    return %c0_i32, %c0_i32_0 : i32, i32
  }
  func.func @transform_5(%arg0: i32) -> (i32, i32) {
    %c0_i32 = arith.constant 0 : i32
    %c0_i32_0 = arith.constant 0 : i32
    %c0_i32_1 = arith.constant 0 : i32
    return %c0_i32, %c0_i32_0 : i32, i32
  }
  func.func @transform_6(%arg0: i32) -> (i32, i32) {
    %c0_i32 = arith.constant 0 : i32
    %c0_i32_0 = arith.constant 0 : i32
    %c0_i32_1 = arith.constant 0 : i32
    return %c0_i32, %c0_i32_0 : i32, i32
  }
  func.func @transform_7(%arg0: i32) -> (i32, i32, i32) {
    %c0_i32 = arith.constant 0 : i32
    %c0_i32_0 = arith.constant 0 : i32
    %c0_i32_1 = arith.constant 0 : i32
    return %arg0, %c0_i32, %c0_i32_0 : i32, i32, i32
  }
  func.func @transform_8(%arg0: i32) -> (i32, i32, i32) {
    %c0_i32 = arith.constant 0 : i32
    %c0_i32_0 = arith.constant 0 : i32
    %c0_i32_1 = arith.constant 0 : i32
    return %arg0, %c0_i32, %c0_i32_0 : i32, i32, i32
  }
}

module attributes {stable_mosaic.version = 11 : i64} {
  func.func @kernel(%arg0: i32, %arg1: memref<2x8xf32, #tpu.memory_space<vmem>>, %arg2: memref<8x32xf32, #tpu.memory_space<vmem>>, %arg3: memref<32x32xf32, #tpu.memory_space<vmem>>, %arg4: memref<32x4224xf32, #tpu.memory_space<vmem>>, %arg5: memref<1x32xf32, #tpu.memory_space<vmem>>, %arg6: memref<1x32xf32, #tpu.memory_space<vmem>>, %arg7: memref<1x4224xf32, #tpu.memory_space<vmem>>, %arg8: memref<2x8x32xf32, #tpu.memory_space<vmem>>, %arg9: memref<2x8x128xf32, #tpu.memory_space<vmem>>) attributes {dimension_semantics = [#tpu.dimension_semantics<parallel>], iteration_bounds = array<i64: 1>, scalar_prefetch = 0 : i64, scratch_operands = 0 : i64, tpu.core_type = #tpu.core_type<tc>, window_params = [{transform_indices = @transform_0, window_bounds = array<i64: 2, 8>}, {pipeline_mode = #tpu.pipeline_mode<synchronous>, transform_indices = @transform_1, window_bounds = array<i64: 8, 32>}, {pipeline_mode = #tpu.pipeline_mode<synchronous>, transform_indices = @transform_2, window_bounds = array<i64: 32, 32>}, {pipeline_mode = #tpu.pipeline_mode<synchronous>, transform_indices = @transform_3, window_bounds = array<i64: 32, 4224>}, {pipeline_mode = #tpu.pipeline_mode<synchronous>, transform_indices = @transform_4, window_bounds = array<i64: 1, 32>}, {pipeline_mode = #tpu.pipeline_mode<synchronous>, transform_indices = @transform_5, window_bounds = array<i64: 1, 32>}, {pipeline_mode = #tpu.pipeline_mode<synchronous>, transform_indices = @transform_6, window_bounds = array<i64: 1, 4224>}, {transform_indices = @transform_7, window_bounds = array<i64: 2, 8, 32>}, {transform_indices = @transform_8, window_bounds = array<i64: 2, 8, 128>}]} {
    %c0 = arith.constant 0 : index
    %c0_0 = arith.constant 0 : index
    %0 = vector.load %arg1[%c0, %c0_0] : memref<2x8xf32, #tpu.memory_space<vmem>>, vector<2x8xf32>
    %c0_1 = arith.constant 0 : index
    %c0_2 = arith.constant 0 : index
    %1 = vector.load %arg2[%c0_1, %c0_2] : memref<8x32xf32, #tpu.memory_space<vmem>>, vector<8x32xf32>
    %cst = arith.constant dense<0.000000e+00> : vector<2x32xf32>
    %2 = tpu.matmul %0, %1, %cst {dimension_numbers = #tpu.dot_dimension_numbers<[1], [0], [0], [1], [0, 0, 1, 1], [], []>} : vector<2x8xf32>, vector<8x32xf32>, vector<2x32xf32> -> vector<2x32xf32>
    %c0_3 = arith.constant 0 : index
    %c0_4 = arith.constant 0 : index
    %3 = vector.load %arg5[%c0_3, %c0_4] : memref<1x32xf32, #tpu.memory_space<vmem>>, vector<1x32xf32>
    %4 = vector.broadcast %3 : vector<1x32xf32> to vector<2x32xf32>
    %5 = arith.addf %2, %4 : vector<2x32xf32>
    %6 = math.tanh %5 : vector<2x32xf32>
    %c0_5 = arith.constant 0 : index
    %c0_6 = arith.constant 0 : index
    %7 = vector.load %arg3[%c0_5, %c0_6] : memref<32x32xf32, #tpu.memory_space<vmem>>, vector<32x32xf32>
    %cst_7 = arith.constant dense<0.000000e+00> : vector<2x32xf32>
    %8 = tpu.matmul %6, %7, %cst_7 {dimension_numbers = #tpu.dot_dimension_numbers<[1], [0], [0], [1], [0, 0, 1, 1], [], []>} : vector<2x32xf32>, vector<32x32xf32>, vector<2x32xf32> -> vector<2x32xf32>
    %c0_8 = arith.constant 0 : index
    %c0_9 = arith.constant 0 : index
    %9 = vector.load %arg6[%c0_8, %c0_9] : memref<1x32xf32, #tpu.memory_space<vmem>>, vector<1x32xf32>
    %10 = vector.broadcast %9 : vector<1x32xf32> to vector<2x32xf32>
    %11 = arith.addf %8, %10 : vector<2x32xf32>
    %12 = math.tanh %11 : vector<2x32xf32>
    %c0_10 = arith.constant 0 : index
    %c0_11 = arith.constant 0 : index
    %13 = vector.load %arg4[%c0_10, %c0_11] : memref<32x4224xf32, #tpu.memory_space<vmem>>, vector<32x4224xf32>
    %cst_12 = arith.constant dense<0.000000e+00> : vector<2x4224xf32>
    %14 = tpu.matmul %12, %13, %cst_12 {dimension_numbers = #tpu.dot_dimension_numbers<[1], [0], [0], [1], [0, 0, 1, 1], [], []>} : vector<2x32xf32>, vector<32x4224xf32>, vector<2x4224xf32> -> vector<2x4224xf32>
    %c0_13 = arith.constant 0 : index
    %c0_14 = arith.constant 0 : index
    %15 = vector.load %arg7[%c0_13, %c0_14] : memref<1x4224xf32, #tpu.memory_space<vmem>>, vector<1x4224xf32>
    %16 = vector.broadcast %15 : vector<1x4224xf32> to vector<2x4224xf32>
    %17 = arith.addf %14, %16 : vector<2x4224xf32>
    %18 = vector.extract_strided_slice %17 {offsets = [0, 0], sizes = [2, 4096], strides = [1, 1]} : vector<2x4224xf32> to vector<2x4096xf32>
    %19 = vector.shape_cast %18 : vector<2x4096xf32> to vector<2x32x128xf32>
    %20 = vector.extract_strided_slice %17 {offsets = [0, 4096], sizes = [2, 128], strides = [1, 1]} : vector<2x4224xf32> to vector<2x128xf32>
    %c0_15 = arith.constant 0 : index
    %c0_16 = arith.constant 0 : index
    %c0_17 = arith.constant 0 : index
    %21 = vector.load %arg8[%c0_15, %c0_16, %c0_17] : memref<2x8x32xf32, #tpu.memory_space<vmem>>, vector<2x8x32xf32>
    "tpu.trace_start"() <{level = 10 : i32, message = "bni,bio->bno"}> : () -> ()
    %cst_18 = arith.constant dense<0.000000e+00> : vector<2x8x128xf32>
    %22 = tpu.matmul %21, %19, %cst_18 {dimension_numbers = #tpu.dot_dimension_numbers<[2], [1], [1], [2], [0, 0, 0, 1, 1, 2], [0], [0]>} : vector<2x8x32xf32>, vector<2x32x128xf32>, vector<2x8x128xf32> -> vector<2x8x128xf32>
    "tpu.trace_stop"() : () -> ()
    %23 = vector.shape_cast %20 : vector<2x128xf32> to vector<2x1x128xf32>
    %24 = vector.broadcast %23 : vector<2x1x128xf32> to vector<2x8x128xf32>
    %25 = arith.addf %22, %24 : vector<2x8x128xf32>
    %cst_19 = arith.constant dense<0.000000e+00> : vector<2x8xf32>
    %26 = vector.multi_reduction <add>, %25, %cst_19 [2] : vector<2x8x128xf32> to vector<2x8xf32>
    %27 = vector.shape_cast %26 : vector<2x8xf32> to vector<2x8x1xf32>
    %28 = arith.mulf %25, %25 : vector<2x8x128xf32>
    %cst_20 = arith.constant dense<0.000000e+00> : vector<2x8xf32>
    %29 = vector.multi_reduction <add>, %28, %cst_20 [2] : vector<2x8x128xf32> to vector<2x8xf32>
    %30 = vector.shape_cast %29 : vector<2x8xf32> to vector<2x8x1xf32>
    %cst_21 = arith.constant 3.125000e-02 : f32
    %31 = vector.broadcast %cst_21 : f32 to vector<2x8x1xf32>
    %32 = arith.mulf %27, %31 : vector<2x8x1xf32>
    %cst_22 = arith.constant 3.125000e-02 : f32
    %33 = vector.broadcast %cst_22 : f32 to vector<2x8x1xf32>
    %34 = arith.mulf %30, %33 : vector<2x8x1xf32>
    %35 = arith.mulf %32, %32 : vector<2x8x1xf32>
    %36 = arith.subf %34, %35 : vector<2x8x1xf32>
    %cst_23 = arith.constant 0.000000e+00 : f32
    %37 = vector.broadcast %cst_23 : f32 to vector<2x8x1xf32>
    %38 = arith.maximumf %36, %37 : vector<2x8x1xf32>
    %39 = vector.broadcast %32 : vector<2x8x1xf32> to vector<2x8x128xf32>
    %40 = arith.subf %25, %39 : vector<2x8x128xf32>
    %cst_24 = arith.constant 9.99999974E-6 : f32
    %41 = vector.broadcast %cst_24 : f32 to vector<2x8x1xf32>
    %42 = arith.addf %38, %41 : vector<2x8x1xf32>
    %43 = math.rsqrt %42 : vector<2x8x1xf32>
    %44 = vector.broadcast %43 : vector<2x8x1xf32> to vector<2x8x128xf32>
    %45 = arith.mulf %40, %44 : vector<2x8x128xf32>
    %46 = math.tanh %45 : vector<2x8x128xf32>
    %c0_25 = arith.constant 0 : index
    %c0_26 = arith.constant 0 : index
    %c0_27 = arith.constant 0 : index
    %47 = vector.load %arg9[%c0_25, %c0_26, %c0_27] : memref<2x8x128xf32, #tpu.memory_space<vmem>>, vector<2x8x128xf32>
    tpu.vector_store %arg9[%c0_25, %c0_26, %c0_27], %46 {strides = array<i32>} : memref<2x8x128xf32, #tpu.memory_space<vmem>>, vector<2x8x128xf32>,
    return
  }
  func.func @transform_0(%arg0: i32) -> (i32, i32) {
    %c0_i32 = arith.constant 0 : i32
    %c0_i32_0 = arith.constant 0 : i32
    return %arg0, %c0_i32 : i32, i32
  }
  func.func @transform_1(%arg0: i32) -> (i32, i32) {
    %c0_i32 = arith.constant 0 : i32
    %c0_i32_0 = arith.constant 0 : i32
    %c0_i32_1 = arith.constant 0 : i32
    return %c0_i32, %c0_i32_0 : i32, i32
  }
  func.func @transform_2(%arg0: i32) -> (i32, i32) {
    %c0_i32 = arith.constant 0 : i32
    %c0_i32_0 = arith.constant 0 : i32
    %c0_i32_1 = arith.constant 0 : i32
    return %c0_i32, %c0_i32_0 : i32, i32
  }
  func.func @transform_3(%arg0: i32) -> (i32, i32) {
    %c0_i32 = arith.constant 0 : i32
    %c0_i32_0 = arith.constant 0 : i32
    %c0_i32_1 = arith.constant 0 : i32
    return %c0_i32, %c0_i32_0 : i32, i32
  }
  func.func @transform_4(%arg0: i32) -> (i32, i32) {
    %c0_i32 = arith.constant 0 : i32
    %c0_i32_0 = arith.constant 0 : i32
    %c0_i32_1 = arith.constant 0 : i32
    return %c0_i32, %c0_i32_0 : i32, i32
  }
  func.func @transform_5(%arg0: i32) -> (i32, i32) {
    %c0_i32 = arith.constant 0 : i32
    %c0_i32_0 = arith.constant 0 : i32
    %c0_i32_1 = arith.constant 0 : i32
    return %c0_i32, %c0_i32_0 : i32, i32
  }
  func.func @transform_6(%arg0: i32) -> (i32, i32) {
    %c0_i32 = arith.constant 0 : i32
    %c0_i32_0 = arith.constant 0 : i32
    %c0_i32_1 = arith.constant 0 : i32
    return %c0_i32, %c0_i32_0 : i32, i32
  }
  func.func @transform_7(%arg0: i32) -> (i32, i32, i32) {
    %c0_i32 = arith.constant 0 : i32
    %c0_i32_0 = arith.constant 0 : i32
    %c0_i32_1 = arith.constant 0 : i32
    return %arg0, %c0_i32, %c0_i32_0 : i32, i32, i32
  }
  func.func @transform_8(%arg0: i32) -> (i32, i32, i32) {
    %c0_i32 = arith.constant 0 : i32
    %c0_i32_0 = arith.constant 0 : i32
    %c0_i32_1 = arith.constant 0 : i32
    return %arg0, %c0_i32, %c0_i32_0 : i32, i32, i32
  }
}

</mosaic_0001>

<bundles_post_ra>
// kernel: tpu_custom_call.1
= control target key start
LH: loop header
LB: loop body
LE: loop exit
PB: predicated region body
PF: predicated region fallthrough
CT: control target
= control target key end

     0   :  { %13 = vsyncpa [#allocation3], 0  ;;  %s2868_s0 = inlined_call_operand.hbm [shape: f32[2,8], index: 0, kind: input, shape index: {}]   ;;  %s2869_s1 = inlined_call_operand.hbm [shape: f32[8,32], index: 1, kind: input, shape index: {}]   ;;  %s2870_s2 = inlined_call_operand.hbm [shape: f32[32,32], index: 2, kind: input, shape index: {}]   ;;  %s2871_s3 = inlined_call_operand.hbm [shape: f32[32,4224], index: 3, kind: input, shape index: {}]   ;;  %s2872_s4 = inlined_call_operand.vmem [shape: f32[1,32], index: 4, kind: input, shape index: {}]   ;;  %s2873_s5 = inlined_call_operand.vmem [shape: f32[1,32], index: 5, kind: input, shape index: {}]   ;;  %s2874_s6 = inlined_call_operand.hbm [shape: f32[1,4224], index: 6, kind: input, shape index: {}]   ;;  %s2875_s7 = inlined_call_operand.hbm [shape: f32[2,8,32], index: 7, kind: input, shape index: {}]   ;;  %s2876_s8 = inlined_call_operand.hbm [shape: f32[2,8,128], index: 8, kind: output, shape index: {}]  }
   0x1   :  { %14 = vsyncpa [#allocation6], 0 }
   0x2   :  { %15 = vsyncpa [#allocation9], 0 }
   0x3   :  { %16 = vsyncpa [#allocation12], 0 }
   0x4   :  { %17 = vsyncpa [#allocation4], 0  ;;  %s2498_s27 = smov [#allocation5]   ;;  %s2499_s29 = smov [#allocation8]  }
   0x5   :  { %s34_s28 = sshll.u32 %s2498_s27, 4  ;;  %s55_s30 = sshll.u32 %s2499_s29, 4  ;;  %s35_s28 = int_to_ptr.vmem [resolvable:$true] %s34_s28  ;;  %s56_s30 = int_to_ptr.vmem [resolvable:$true] %s55_s30 }
   0x6   :  { %s2356_s9 = scalar_lea.vmem %s35_s28, 128  ;;  %p2361_p1 = scmp.lt.s32.totalorder %s35_s28, %s35_s28 }
   0x7   :  { %p2357_p0 = scmp.ne.s32.totalorder %s35_s28, %s2356_s9  ;;  %p2362_p2 = scmp.lt.s32.totalorder %s2356_s9, %s2356_s9 }
   0x9   :  { %p2363_p3 = por %p2362_p2, %p2361_p1 }
   0xb   :  { %p2364_p4 = pnand %p2363_p3, %p2357_p0 }
   0xd   :  { %2367 = shalt.err (!%p2364_p4)
}
   0xe   :  { %37 = dma.hbm_to_vmem [thread:$0]  %s2869_s1, 128, %s35_s28, [#allocation6]  }
   0xf   :  { %s2376_s12 = scalar_lea.vmem %s56_s30, 16896  ;;  %p2381_p6 = scmp.lt.s32.totalorder %s56_s30, %s56_s30 }
  0x10   :  { %p2377_p5 = scmp.ne.s32.totalorder %s56_s30, %s2376_s12  ;;  %p2382_p7 = scmp.lt.s32.totalorder %s2376_s12, %s2376_s12 }
  0x12   :  { %p2383_p8 = por %p2382_p7, %p2381_p6 }
  0x14   :  { %p2384_p9 = pnand %p2383_p8, %p2377_p5 }
  0x16   :  { %2387 = shalt.err (!%p2384_p9)
}
  0x17   :  { %s2500_s13 = smov 4224   ;;  %s2501_s14 = smov 264  }
  0x18   :  { %61 = dma.hbm_to_vmem [thread:$0]  %s2871_s3, 16896, %s56_s30, [#allocation9], %s2500_s13, %s2500_s13, %s2501_s14  }
  0x19   :  { %s2502_s17 = smov [#allocation2]   ;;  %s2503_s19 = smov [#allocation7]  }
  0x1a   :  { %s24_s18 = sshll.u32 %s2502_s17, 4  ;;  %s43_s20 = sshll.u32 %s2503_s19, 4  ;;  %s25_s18 = int_to_ptr.vmem [resolvable:$true] %s24_s18  ;;  %s44_s20 = int_to_ptr.vmem [resolvable:$true] %s43_s20 }
  0x1b   :  { %s2396_s1 = scalar_lea.vmem %s25_s18, 32  ;;  %p2401_p11 = scmp.lt.s32.totalorder %s25_s18, %s25_s18 }
  0x1c   :  { %p2397_p10 = scmp.ne.s32.totalorder %s25_s18, %s2396_s1  ;;  %p2402_p12 = scmp.lt.s32.totalorder %s2396_s1, %s2396_s1 }
  0x1e   :  { %p2403_p13 = por %p2402_p12, %p2401_p11 }
  0x20   :  { %p2404_p0 = pnand %p2403_p13, %p2397_p10 }
  0x22   :  { %2407 = shalt.err (!%p2404_p0)
}
  0x23   :  { %27 = dma.hbm_to_vmem [thread:$0]  %s2868_s0, 32, %s25_s18, [#allocation3]  }
  0x24   :  { %s2416_s23 = scalar_lea.vmem %s44_s20, 512  ;;  %p2421_p2 = scmp.lt.s32.totalorder %s44_s20, %s44_s20 }
  0x25   :  { %p2417_p1 = scmp.ne.s32.totalorder %s44_s20, %s2416_s23  ;;  %p2422_p3 = scmp.lt.s32.totalorder %s2416_s23, %s2416_s23 }
  0x27   :  { %p2423_p4 = por %p2422_p3, %p2421_p2 }
  0x29   :  { %p2424_p5 = pnand %p2423_p4, %p2417_p1 }
  0x2b   :  { %2427 = shalt.err (!%p2424_p5)
}
  0x2c   :  { %s2504_s3 = smov 128   ;;  %s2505_s24 = smov 8  }
  0x2d   :  { %49 = dma.hbm_to_vmem [thread:$0]  %s2870_s2, 512, %s44_s20, [#allocation6], %s2504_s3, %s2504_s3, %s2505_s24  }
  0x2e   :  { %s2506_s27 = smov [#allocation10]   ;;  %s2507_s29 = smov [#allocation11]  }
  0x2f   :  { %s72_s28 = sshll.u32 %s2506_s27, 4  ;;  %s81_s0 = sshll.u32 %s2507_s29, 4  ;;  %s73_s28 = int_to_ptr.vmem [resolvable:$true] %s72_s28  ;;  %s82_s0 = int_to_ptr.vmem [resolvable:$true] %s81_s0 }
  0x30   :  { %s2436_s30 = scalar_lea.vmem %s73_s28, 528  ;;  %s2440_s9 = scalar_lea.vmem %s73_s28, 544 }
  0x31   :  { %p2437_p6 = scmp.ne.s32.totalorder %s73_s28, %s2436_s30  ;;  %p2441_p7 = scmp.lt.s32.totalorder %s73_s28, %s73_s28 }
  0x32   :  { %p2442_p8 = scmp.lt.s32.totalorder %s2440_s9, %s2436_s30 }
  0x34   :  { %p2443_p9 = por %p2442_p8, %p2441_p7 }
  0x36   :  { %p2444_p10 = pnand %p2443_p9, %p2437_p6 }
  0x38   :  { %2447 = shalt.err (!%p2444_p10)
}
  0x39   :  { %75 = dma.hbm_to_vmem [thread:$0]  %s2874_s6, 528, %s73_s28, [#allocation9]  }
  0x3a   :  { %s2456_s12 = scalar_lea.vmem %s82_s0, 256  ;;  %p2461_p12 = scmp.lt.s32.totalorder %s82_s0, %s82_s0 }
  0x3b   :  { %p2457_p11 = scmp.ne.s32.totalorder %s82_s0, %s2456_s12  ;;  %p2462_p13 = scmp.lt.s32.totalorder %s2456_s12, %s2456_s12 }
  0x3d   :  { %p2463_p0 = por %p2462_p13, %p2461_p12 }
  0x3f   :  { %p2464_p1 = pnand %p2463_p0, %p2457_p11 }
  0x41   :  { %2467 = shalt.err (!%p2464_p1)
}
  0x42   :  { %87 = dma.hbm_to_vmem [thread:$0]  %s2875_s7, 256, %s82_s0, [#allocation12], %s2504_s3, %s2504_s3, %s2505_s24  }
  0x43   :  { %2488 = dma.done.wait [#allocation3], 32  }
  0x44   :  { %2489 = vsyncadd [#allocation3], 4294967264 }
  0x45   :  { %2490 = dma.done.wait [#allocation6], 640  }
  0x46   :  { %2491 = vsyncadd [#allocation6], 4294966656 }
  0x47   :  { %2492 = dma.done.wait [#allocation9], 17424  }
  0x48   :  { %2493 = vsyncadd [#allocation9], 4294949872 }
  0x49   :  { %2494 = dma.done.wait [#allocation12], 256  }
  0x4a   :  { %2495 = vsyncadd [#allocation12], 4294967040  ;;  %v2877_v0 = vmov 0.0   ;;  %vm2509_vm0 = vmmov 0   ;;  %vm115_vm1 = vcmask 64512   ;;  %v107_v1 = vld [vmem:[#allocation5] sm:$0xff] }
  0x4b   :  { %2271 = vmatprep.subr.mxu0 %v2877_v0  ;;  %2273 = vmatprep.mubr.msk.f32.mxu0 %vm2509_vm0, %v2877_v0  ;;  %v106_v2 = vld [vmem:[#allocation2] sm:$0x3]  ;;  %v193_v3 = vld [vmem:[#allocation7 + $0x18] sm:$0xff]  ;;  %v191_v5 = vld [vmem:[#allocation7 + $0x8] sm:$0xff]  ;;  %vm201_vm2 = vcmask 261120  }
  0x4c   :  { %2276 = vmatprep.subr.mxu1 %v2877_v0  ;;  %2284 = vmatprep.mubr.msk.f32.mxu1 %vm2509_vm0, %v2877_v0  ;;  %v192_v4 = vld [vmem:[#allocation7 + $0x10] sm:$0xff]  ;;  %v190_v6 = vld [vmem:[#allocation7] sm:$0xff]  ;;  %v375_v14 = vld [vmem:[#allocation8 + $0x318] sm:$0xff] }
  0x4d   :  { %2272 = vmatpush3.msra.mxu0 %v107_v1  ;;  %2277 = vmatpush3.msra.mxu1 %v193_v3  ;;  %v2225_v7 = vld [vmem:[%s2872_s4] ss:$0 sm:$0xff]  ;;  %v376_v12 = vld [vmem:[#allocation8 + $0x320] sm:$0xff]  ;;  %v377_v15 = vld [vmem:[#allocation8 + $0x328] sm:$0xff] }
  0x4e   :  { %2274 = vmatmul.mubr.msk.f32.vlgmr.msra.gmra.mxu0 %vm115_vm1, %v106_v2  ;;  %2278 = vmatprep.subr.mxu1 %v2877_v0  ;;  %v378_v13 = vld [vmem:[#allocation8 + $0x330] sm:$0xff]  ;;  %v343_v16 = vld [vmem:[#allocation8 + $0x218] sm:$0xff]  ;;  %v345_v17 = vld [vmem:[#allocation8 + $0x228] sm:$0xff] }
  0x4f   :  { %650 = vmatprep.mubr.f32.mxu0 %v2877_v0  ;;  %2279 = vmatpush3.msra.mxu1 %v192_v4  ;;  %v342_v18 = vld [vmem:[#allocation8 + $0x210] sm:$0xff]  ;;  %v344_v19 = vld [vmem:[#allocation8 + $0x220] sm:$0xff]  ;;  %v309_v22 = vld [vmem:[#allocation8 + $0x108] sm:$0xff] }
  0x50   :  { %2280 = vmatprep.subr.mxu1 %v2877_v0  ;;  %610 = vmatprep.subr.mxu0 %v376_v12  ;;  %v310_v20 = vld [vmem:[#allocation8 + $0x110] sm:$0xff]  ;;  %v312_v21 = vld [vmem:[#allocation8 + $0x120] sm:$0xff]  ;;  %v311_v23 = vld [vmem:[#allocation8 + $0x118] sm:$0xff] }
  0x51   :  { %2281 = vmatpush3.msra.mxu1 %v191_v5  ;;  %611 = vmatpush1.msra.mxu0 %v375_v14  ;;  %v277_v24 = vld [vmem:[#allocation8 + $0x8] sm:$0xff]  ;;  %v279_v25 = vld [vmem:[#allocation8 + $0x18] sm:$0xff]  ;;  %v276_v26 = vld [vmem:[#allocation8] sm:$0xff] }
  0x52   :  { %2282 = vmatprep.subr.mxu1 %v2877_v0  ;;  %612 = vmatprep.subr.mxu0 %v343_v16  ;;  %v278_v27 = vld [vmem:[#allocation8 + $0x10] sm:$0xff]  ;;  %v380_v28 = vld [vmem:[#allocation8 + $0x340] sm:$0xff]  ;;  %v379_v34 = vld [vmem:[#allocation8 + $0x338] sm:$0xff] }
  0x53   :  { %2283 = vmatpush3.msra.mxu1 %v190_v6  ;;  %613 = vmatpush1.msra.mxu0 %v342_v18  ;;  %v382_v29 = vld [vmem:[#allocation8 + $0x350] sm:$0xff]  ;;  %v381_v35 = vld [vmem:[#allocation8 + $0x348] sm:$0xff]  ;;  %v347_v37 = vld [vmem:[#allocation8 + $0x238] sm:$0xff] }
  0x54   :  { %681 = vmatprep.subr.mxu1 %v378_v13  ;;  %614 = vmatprep.subr.mxu0 %v310_v20  ;;  %v2227_v30 = vld [vmem:[%s2873_s5] ss:$0 sm:$0xff]  ;;  %v349_v38 = vld [vmem:[#allocation8 + $0x248] sm:$0xff]  ;;  %v348_v40 = vld [vmem:[#allocation8 + $0x240] sm:$0xff]  ;;  %s2513_s5 = smov [#allocation13]  }
  0x55   :  { %615 = vmatpush1.msra.mxu0 %v309_v22  ;;  %v346_v39 = vld [vmem:[#allocation8 + $0x230] sm:$0xff]  ;;  %v316_v42 = vld [vmem:[#allocation8 + $0x140] sm:$0xff]  ;;  %v313_v43 = vld [vmem:[#allocation8 + $0x128] sm:$0xff]  ;;  %s2210_s15 = sshll.u32 %s2513_s5, 4  ;;  %s2211_s15 = int_to_ptr.vmem [resolvable:$true] %s2210_s15 }
  0x56   :  { %616 = vmatprep.subr.mxu0 %v277_v24  ;;  %v314_v41 = vld [vmem:[#allocation8 + $0x130] sm:$0xff]  ;;  %v315_v44 = vld [vmem:[#allocation8 + $0x138] sm:$0xff]  ;;  %v281_v45 = vld [vmem:[#allocation8 + $0x28] sm:$0xff]  ;;  %s2468_s16 = scalar_lea.vmem %s2211_s15, 256  ;;  %p2473_p3 = scmp.lt.s32.totalorder %s2211_s15, %s2211_s15 }
  0x57   :  { %617 = vmatpush1.msra.mxu0 %v276_v26  ;;  %v283_v46 = vld [vmem:[#allocation8 + $0x38] sm:$0xff]  ;;  %v280_v47 = vld [vmem:[#allocation8 + $0x20] sm:$0xff]  ;;  %v282_v48 = vld [vmem:[#allocation8 + $0x30] sm:$0xff]  ;;  %p2469_p2 = scmp.ne.s32.totalorder %s2211_s15, %s2468_s16  ;;  %p2474_p4 = scmp.lt.s32.totalorder %s2468_s16, %s2468_s16 }
  0x58   :  { %752 = vmatprep.subr.mxu0 %v380_v28  ;;  %v384_v49 = vld [vmem:[#allocation8 + $0x360] sm:$0xff]  ;;  %v386_v50 = vld [vmem:[#allocation8 + $0x370] sm:$0xff]  ;;  %v383_v51 = vld [vmem:[#allocation8 + $0x358] sm:$0xff] }
  0x59   :  { %v385_v52 = vld [vmem:[#allocation8 + $0x368] sm:$0xff]  ;;  %v351_v53 = vld [vmem:[#allocation8 + $0x258] sm:$0xff]  ;;  %v350_v55 = vld [vmem:[#allocation8 + $0x250] sm:$0xff]  ;;  %p2475_p5 = por %p2474_p4, %p2473_p3 }
  0x5a   :  { %v353_v54 = vld [vmem:[#allocation8 + $0x268] sm:$0xff]  ;;  %v352_v56 = vld [vmem:[#allocation8 + $0x260] sm:$0xff]  ;;  %v318_v57 = vld [vmem:[#allocation8 + $0x150] sm:$0xff] }
  0x5b   :  { %v320_v58 = vld [vmem:[#allocation8 + $0x160] sm:$0xff]  ;;  %v317_v59 = vld [vmem:[#allocation8 + $0x148] sm:$0xff]  ;;  %v319_v60 = vld [vmem:[#allocation8 + $0x158] sm:$0xff]  ;;  %p2476_p6 = pnand %p2475_p5, %p2469_p2 }
  0x5c   :  { %v285_v61 = vld [vmem:[#allocation8 + $0x48] sm:$0xff]  ;;  %v287_v62 = vld [vmem:[#allocation8 + $0x58] sm:$0xff]  ;;  %v284_v63 = vld [vmem:[#allocation8 + $0x40] sm:$0xff] }
  0x5d   :  { %v286_v1 = vld [vmem:[#allocation8 + $0x50] sm:$0xff]  ;;  %v388_v2 = vld [vmem:[#allocation8 + $0x380] sm:$0xff]  ;;  %v387_v4 = vld [vmem:[#allocation8 + $0x378] sm:$0xff] }
  0x5e   :  { %v390_v3 = vld [vmem:[#allocation8 + $0x390] sm:$0xff]  ;;  %v389_v5 = vld [vmem:[#allocation8 + $0x388] sm:$0xff]  ;;  %v355_v6 = vld [vmem:[#allocation8 + $0x278] sm:$0xff] }
  0x5f   :  { %v321_v12 = vld [vmem:[#allocation8 + $0x168] sm:$0xff]  ;;  %v323_v13 = vld [vmem:[#allocation8 + $0x178] sm:$0xff]  ;;  %v288_v16 = vld [vmem:[#allocation8 + $0x60] sm:$0xff] }
  0x60   :  { %v289_v14 = vld [vmem:[#allocation8 + $0x68] sm:$0xff]  ;;  %v392_v18 = vld [vmem:[#allocation8 + $0x3a0] sm:$0xff]  ;;  %v391_v20 = vld [vmem:[#allocation8 + $0x398] sm:$0xff] }
  0x61   :  { %v359_v22 = vld [vmem:[#allocation8 + $0x298] sm:$0xff]  ;;  %v358_v24 = vld [vmem:[#allocation8 + $0x290] sm:$0xff]  ;;  %v325_v28 = vld [vmem:[#allocation8 + $0x188] sm:$0xff] }
  0x62   :  { %v326_v26 = vld [vmem:[#allocation8 + $0x190] sm:$0xff] }
 0x10e   :  { %v185_v8 = vpop.f32.mrf.mxu0 }
 0x10f   :  { %v186_v9 = vadd.f32 %v2225_v7, %v185_v8  ;;  %v357_v7 = vld [vmem:[#allocation8 + $0x288] sm:$0xff]  ;;  %v354_v8 = vld [vmem:[#allocation8 + $0x270] sm:$0xff] }
 0x110   :  { %v2275_v10 = vpop.f32.mrf.mxu0 }
 0x111   :  { %2336 = vtanh.f32 %v186_v9  ;;  %v356_v9 = vld [vmem:[#allocation8 + $0x280] sm:$0xff]  ;;  %v322_v10 = vld [vmem:[#allocation8 + $0x170] sm:$0xff] }
 0x11e   :  { %v2337_v11 = vpop.eup %2336 }
 0x11f   :  { %2285 = vmatmul.mubr.msk.f32.vlgmr.msra.gmra.mxu1 %vm201_vm2, %v2337_v11  ;;  %v324_v11 = vld [vmem:[#allocation8 + $0x180] sm:$0xff] }
 0x120   :  { %721 = vmatprep.mubr.f32.mxu1 %v2877_v0  ;;  %682 = vmatpush1.msra.mxu1 %v377_v15  ;;  %v291_v15 = vld [vmem:[#allocation8 + $0x78] sm:$0xff] }
 0x121   :  { %683 = vmatprep.subr.mxu1 %v345_v17  ;;  %v290_v17 = vld [vmem:[#allocation8 + $0x70] sm:$0xff] }
 0x122   :  { %684 = vmatpush1.msra.mxu1 %v344_v19  ;;  %v394_v19 = vld [vmem:[#allocation8 + $0x3b0] sm:$0xff] }
 0x123   :  { %685 = vmatprep.subr.mxu1 %v312_v21  ;;  %v393_v21 = vld [vmem:[#allocation8 + $0x3a8] sm:$0xff] }
 0x124   :  { %686 = vmatpush1.msra.mxu1 %v311_v23  ;;  %v361_v23 = vld [vmem:[#allocation8 + $0x2a8] sm:$0xff] }
 0x125   :  { %687 = vmatprep.subr.mxu1 %v279_v25  ;;  %v360_v25 = vld [vmem:[#allocation8 + $0x2a0] sm:$0xff] }
 0x126   :  { %688 = vmatpush1.msra.mxu1 %v278_v27  ;;  %v328_v27 = vld [vmem:[#allocation8 + $0x1a0] sm:$0xff] }
 0x127   :  { %823 = vmatprep.subr.mxu1 %v382_v29  ;;  %v327_v29 = vld [vmem:[#allocation8 + $0x198] sm:$0xff] }
 0x1df   :  { %v271_v31 = vpop.f32.mrf.mxu1 }
 0x1e0   :  { %v272_v32 = vadd.f32 %v2227_v30, %v271_v31  ;;  %v293_v30 = vld [vmem:[#allocation8 + $0x88] sm:$0xff]  ;;  %v295_v31 = vld [vmem:[#allocation8 + $0x98] sm:$0xff] }
 0x1e1   :  { %v2286_v33 = vpop.f32.mrf.mxu1 }
 0x1e2   :  { %2338 = vtanh.f32 %v272_v32  ;;  %v292_v32 = vld [vmem:[#allocation8 + $0x80] sm:$0xff]  ;;  %v294_v33 = vld [vmem:[#allocation8 + $0x90] sm:$0xff] }
 0x1ef   :  { %v2601_v36 = vpop.eup %2338 }
 0x1f0   :  { %2230 = vmatmul.mubr.msk.f32.vlgmr.msra.gmra.mxu0 %vm201_vm2, %v2601_v36  ;;  %2231 = vmatmul.mubr.msk.f32.vlgmr.msra.gmra.mxu1 %vm201_vm2, %v2601_v36 }
 0x1f1   :  { %753 = vmatpush1.msra.mxu0 %v379_v34  ;;  %824 = vmatpush1.msra.mxu1 %v381_v35  ;;  %v396_v34 = vld [vmem:[#allocation8 + $0x3c0] sm:$0xff]  ;;  %v398_v35 = vld [vmem:[#allocation8 + $0x3d0] sm:$0xff] }
 0x1f2   :  { %754 = vmatprep.subr.mxu0 %v347_v37  ;;  %825 = vmatprep.subr.mxu1 %v349_v38  ;;  %v395_v37 = vld [vmem:[#allocation8 + $0x3b8] sm:$0xff]  ;;  %v397_v38 = vld [vmem:[#allocation8 + $0x3c8] sm:$0xff] }
 0x1f3   :  { %755 = vmatpush1.msra.mxu0 %v346_v39  ;;  %826 = vmatpush1.msra.mxu1 %v348_v40  ;;  %v363_v39 = vld [vmem:[#allocation8 + $0x2b8] sm:$0xff]  ;;  %v365_v40 = vld [vmem:[#allocation8 + $0x2c8] sm:$0xff] }
 0x1f4   :  { %756 = vmatprep.subr.mxu0 %v314_v41  ;;  %827 = vmatprep.subr.mxu1 %v316_v42  ;;  %v362_v41 = vld [vmem:[#allocation8 + $0x2b0] sm:$0xff]  ;;  %v364_v42 = vld [vmem:[#allocation8 + $0x2c0] sm:$0xff] }
 0x1f5   :  { %757 = vmatpush1.msra.mxu0 %v313_v43  ;;  %828 = vmatpush1.msra.mxu1 %v315_v44  ;;  %v330_v43 = vld [vmem:[#allocation8 + $0x1b0] sm:$0xff]  ;;  %v332_v44 = vld [vmem:[#allocation8 + $0x1c0] sm:$0xff] }
 0x1f6   :  { %758 = vmatprep.subr.mxu0 %v281_v45  ;;  %829 = vmatprep.subr.mxu1 %v283_v46  ;;  %v329_v45 = vld [vmem:[#allocation8 + $0x1a8] sm:$0xff]  ;;  %v331_v46 = vld [vmem:[#allocation8 + $0x1b8] sm:$0xff] }
 0x1f7   :  { %759 = vmatpush1.msra.mxu0 %v280_v47  ;;  %792 = vmatprep.mubr.f32.mxu0 %v2877_v0  ;;  %v297_v47 = vld [vmem:[#allocation8 + $0xa8] sm:$0xff] }
 0x1f8   :  { %830 = vmatpush1.msra.mxu1 %v282_v48  ;;  %863 = vmatprep.mubr.f32.mxu1 %v2877_v0  ;;  %v299_v48 = vld [vmem:[#allocation8 + $0xb8] sm:$0xff] }
 0x1f9   :  { %2232 = vmatmul.mubr.msk.f32.vlgmr.msra.gmra.mxu0 %vm201_vm2, %v2601_v36  ;;  %2233 = vmatmul.mubr.msk.f32.vlgmr.msra.gmra.mxu1 %vm201_vm2, %v2601_v36 }
 0x1fa   :  { %894 = vmatprep.subr.mxu0 %v384_v49  ;;  %965 = vmatprep.subr.mxu1 %v386_v50  ;;  %v296_v49 = vld [vmem:[#allocation8 + $0xa0] sm:$0xff]  ;;  %v298_v50 = vld [vmem:[#allocation8 + $0xb0] sm:$0xff] }
 0x1fb   :  { %895 = vmatpush1.msra.mxu0 %v383_v51  ;;  %966 = vmatpush1.msra.mxu1 %v385_v52  ;;  %v400_v51 = vld [vmem:[#allocation8 + $0x3e0] sm:$0xff]  ;;  %v402_v52 = vld [vmem:[#allocation8 + $0x3f0] sm:$0xff] }
 0x1fc   :  { %896 = vmatprep.subr.mxu0 %v351_v53  ;;  %967 = vmatprep.subr.mxu1 %v353_v54  ;;  %v399_v53 = vld [vmem:[#allocation8 + $0x3d8] sm:$0xff]  ;;  %v401_v54 = vld [vmem:[#allocation8 + $0x3e8] sm:$0xff] }
 0x1fd   :  { %897 = vmatpush1.msra.mxu0 %v350_v55  ;;  %968 = vmatpush1.msra.mxu1 %v352_v56  ;;  %v367_v55 = vld [vmem:[#allocation8 + $0x2d8] sm:$0xff]  ;;  %v369_v56 = vld [vmem:[#allocation8 + $0x2e8] sm:$0xff] }
 0x1fe   :  { %898 = vmatprep.subr.mxu0 %v318_v57  ;;  %969 = vmatprep.subr.mxu1 %v320_v58  ;;  %v366_v57 = vld [vmem:[#allocation8 + $0x2d0] sm:$0xff]  ;;  %v368_v58 = vld [vmem:[#allocation8 + $0x2e0] sm:$0xff] }
 0x1ff   :  { %899 = vmatpush1.msra.mxu0 %v317_v59  ;;  %970 = vmatpush1.msra.mxu1 %v319_v60  ;;  %v334_v59 = vld [vmem:[#allocation8 + $0x1d0] sm:$0xff]  ;;  %v336_v60 = vld [vmem:[#allocation8 + $0x1e0] sm:$0xff] }
 0x200   :  { %900 = vmatprep.subr.mxu0 %v285_v61  ;;  %971 = vmatprep.subr.mxu1 %v287_v62  ;;  %v333_v61 = vld [vmem:[#allocation8 + $0x1c8] sm:$0xff]  ;;  %v335_v62 = vld [vmem:[#allocation8 + $0x1d8] sm:$0xff] }
 0x201   :  { %901 = vmatpush1.msra.mxu0 %v284_v63  ;;  %934 = vmatprep.mubr.f32.mxu0 %v2877_v0  ;;  %v301_v63 = vld [vmem:[#allocation8 + $0xc8] sm:$0xff] }
 0x202   :  { %972 = vmatpush1.msra.mxu1 %v286_v1  ;;  %1005 = vmatprep.mubr.f32.mxu1 %v2877_v0  ;;  %v303_v1 = vld [vmem:[#allocation8 + $0xd8] sm:$0xff] }
 0x203   :  { %2234 = vmatmul.mubr.msk.f32.vlgmr.msra.gmra.mxu0 %vm201_vm2, %v2601_v36  ;;  %2235 = vmatmul.mubr.msk.f32.vlgmr.msra.gmra.mxu1 %vm201_vm2, %v2601_v36 }
 0x204   :  { %1036 = vmatprep.subr.mxu0 %v388_v2  ;;  %1107 = vmatprep.subr.mxu1 %v390_v3  ;;  %v300_v2 = vld [vmem:[#allocation8 + $0xc0] sm:$0xff]  ;;  %v302_v3 = vld [vmem:[#allocation8 + $0xd0] sm:$0xff] }
 0x205   :  { %1037 = vmatpush1.msra.mxu0 %v387_v4  ;;  %1108 = vmatpush1.msra.mxu1 %v389_v5  ;;  %v404_v4 = vld [vmem:[#allocation8 + $0x400] sm:$0xff]  ;;  %v406_v5 = vld [vmem:[#allocation8 + $0x410] sm:$0xff] }
 0x206   :  { %1038 = vmatprep.subr.mxu0 %v355_v6  ;;  %1109 = vmatprep.subr.mxu1 %v357_v7  ;;  %v403_v6 = vld [vmem:[#allocation8 + $0x3f8] sm:$0xff]  ;;  %v405_v7 = vld [vmem:[#allocation8 + $0x408] sm:$0xff] }
 0x207   :  { %1039 = vmatpush1.msra.mxu0 %v354_v8  ;;  %1110 = vmatpush1.msra.mxu1 %v356_v9  ;;  %v371_v8 = vld [vmem:[#allocation8 + $0x2f8] sm:$0xff]  ;;  %v373_v9 = vld [vmem:[#allocation8 + $0x308] sm:$0xff] }
 0x208   :  { %1040 = vmatprep.subr.mxu0 %v322_v10  ;;  %1111 = vmatprep.subr.mxu1 %v324_v11  ;;  %v370_v10 = vld [vmem:[#allocation8 + $0x2f0] sm:$0xff]  ;;  %v372_v11 = vld [vmem:[#allocation8 + $0x300] sm:$0xff] }
 0x209   :  { %1041 = vmatpush1.msra.mxu0 %v321_v12  ;;  %1112 = vmatpush1.msra.mxu1 %v323_v13  ;;  %v338_v12 = vld [vmem:[#allocation8 + $0x1f0] sm:$0xff]  ;;  %v340_v13 = vld [vmem:[#allocation8 + $0x200] sm:$0xff] }
 0x20a   :  { %1042 = vmatprep.subr.mxu0 %v289_v14  ;;  %1113 = vmatprep.subr.mxu1 %v291_v15  ;;  %v337_v14 = vld [vmem:[#allocation8 + $0x1e8] sm:$0xff]  ;;  %v339_v15 = vld [vmem:[#allocation8 + $0x1f8] sm:$0xff] }
 0x20b   :  { %1043 = vmatpush1.msra.mxu0 %v288_v16  ;;  %1076 = vmatprep.mubr.f32.mxu0 %v2877_v0  ;;  %v305_v16 = vld [vmem:[#allocation8 + $0xe8] sm:$0xff] }
 0x20c   :  { %1114 = vmatpush1.msra.mxu1 %v290_v17  ;;  %1147 = vmatprep.mubr.f32.mxu1 %v2877_v0  ;;  %v307_v17 = vld [vmem:[#allocation8 + $0xf8] sm:$0xff] }
 0x20d   :  { %2236 = vmatmul.mubr.msk.f32.vlgmr.msra.gmra.mxu0 %vm201_vm2, %v2601_v36  ;;  %2237 = vmatmul.mubr.msk.f32.vlgmr.msra.gmra.mxu1 %vm201_vm2, %v2601_v36 }
 0x20e   :  { %1178 = vmatprep.subr.mxu0 %v392_v18  ;;  %1249 = vmatprep.subr.mxu1 %v394_v19  ;;  %v304_v18 = vld [vmem:[#allocation8 + $0xe0] sm:$0xff]  ;;  %v306_v19 = vld [vmem:[#allocation8 + $0xf0] sm:$0xff] }
 0x20f   :  { %1179 = vmatpush1.msra.mxu0 %v391_v20  ;;  %1250 = vmatpush1.msra.mxu1 %v393_v21  ;;  %v407_v20 = vld [vmem:[#allocation8 + $0x418] sm:$0xff]  ;;  %v374_v21 = vld [vmem:[#allocation8 + $0x310] sm:$0xff] }
 0x210   :  { %1180 = vmatprep.subr.mxu0 %v359_v22  ;;  %1251 = vmatprep.subr.mxu1 %v361_v23  ;;  %v341_v22 = vld [vmem:[#allocation8 + $0x208] sm:$0xff]  ;;  %v308_v23 = vld [vmem:[#allocation8 + $0x100] sm:$0xff] }
 0x211   :  { %1181 = vmatpush1.msra.mxu0 %v358_v24  ;;  %1252 = vmatpush1.msra.mxu1 %v360_v25 }
 0x212   :  { %1182 = vmatprep.subr.mxu0 %v326_v26  ;;  %1253 = vmatprep.subr.mxu1 %v328_v27 }
 0x213   :  { %1183 = vmatpush1.msra.mxu0 %v325_v28  ;;  %1254 = vmatpush1.msra.mxu1 %v327_v29 }
 0x214   :  { %1184 = vmatprep.subr.mxu0 %v293_v30  ;;  %1255 = vmatprep.subr.mxu1 %v295_v31 }
 0x215   :  { %1185 = vmatpush1.msra.mxu0 %v292_v32  ;;  %1218 = vmatprep.mubr.f32.mxu0 %v2877_v0 }
 0x216   :  { %1256 = vmatpush1.msra.mxu1 %v294_v33  ;;  %1289 = vmatprep.mubr.f32.mxu1 %v2877_v0 }
 0x217   :  { %2238 = vmatmul.mubr.msk.f32.vlgmr.msra.gmra.mxu0 %vm201_vm2, %v2601_v36  ;;  %2239 = vmatmul.mubr.msk.f32.vlgmr.msra.gmra.mxu1 %vm201_vm2, %v2601_v36 }
 0x218   :  { %1320 = vmatprep.subr.mxu0 %v396_v34  ;;  %1391 = vmatprep.subr.mxu1 %v398_v35  ;;  %v418_v35 = vlaneseq }
 0x219   :  { %1321 = vmatpush1.msra.mxu0 %v395_v37  ;;  %1392 = vmatpush1.msra.mxu1 %v397_v38 }
 0x21a   :  { %1322 = vmatprep.subr.mxu0 %v363_v39  ;;  %1393 = vmatprep.subr.mxu1 %v365_v40  ;;  %v2691_v39 = vshrl.u32 %v418_v35, 7 }
 0x21b   :  { %1323 = vmatpush1.msra.mxu0 %v362_v41  ;;  %1394 = vmatpush1.msra.mxu1 %v364_v42  ;;  %v2510_v42 = vmov 1983009808  }
 0x21c   :  { %1324 = vmatprep.subr.mxu0 %v330_v43  ;;  %1395 = vmatprep.subr.mxu1 %v332_v44  ;;  %2889 = vst [vmem:[#allocation23_spill] sm:$0xff] %v2691_v39  ;;  %v1794_v43 = vunpack.c.l.s4 %v2510_v42 }
 0x21d   :  { %1325 = vmatpush1.msra.mxu0 %v329_v45  ;;  %1396 = vmatpush1.msra.mxu1 %v331_v46  ;;  %v2702_v46 = vsub.s32 0, %v2691_v39 }
 0x21e   :  { %1326 = vmatprep.subr.mxu0 %v297_v47  ;;  %1397 = vmatprep.subr.mxu1 %v299_v48  ;;  %v2705_v47 = vsub.s32 2, %v2691_v39  ;;  %v2708_v48 = vsub.s32 1, %v2691_v39 }
 0x21f   :  { %1327 = vmatpush1.msra.mxu0 %v296_v49  ;;  %1360 = vmatprep.mubr.f32.mxu0 %v2877_v0  ;;  %2891 = vst [vmem:[#allocation25_spill] sm:$0xff] %v2702_v46  ;;  %v2711_v49 = vsub.s32 3, %v2691_v39 }
 0x220   :  { %1398 = vmatpush1.msra.mxu1 %v298_v50  ;;  %1431 = vmatprep.mubr.f32.mxu1 %v2877_v0  ;;  %v2713_v50 = vld [vmem:[#allocation10] sm:$0xff] }
 0x221   :  { %2240 = vmatmul.mubr.msk.f32.vlgmr.msra.gmra.mxu0 %vm201_vm2, %v2601_v36  ;;  %2241 = vmatmul.mubr.msk.f32.vlgmr.msra.gmra.mxu1 %vm201_vm2, %v2601_v36 }
 0x222   :  { %1462 = vmatprep.subr.mxu0 %v400_v51  ;;  %1533 = vmatprep.subr.mxu1 %v402_v52  ;;  %v1795_v51 = vunpack.c.0.s8 %v1794_v43  ;;  %v2511_v52 = vmov 1934713408  }
 0x223   :  { %1463 = vmatpush1.msra.mxu0 %v399_v53  ;;  %1534 = vmatpush1.msra.mxu1 %v401_v54  ;;  %v2715_v53 = vunpack.c.l.s4 %v2511_v52  ;;  %v2718_v54 = vsub.s32 4, %v2691_v39 }
 0x224   :  { %1464 = vmatprep.subr.mxu0 %v367_v55  ;;  %1535 = vmatprep.subr.mxu1 %v369_v56  ;;  %v2721_v55 = vsub.s32 6, %v2691_v39  ;;  %v2724_v56 = vsub.s32 5, %v2691_v39 }
 0x225   :  { %1465 = vmatpush1.msra.mxu0 %v366_v57  ;;  %1536 = vmatpush1.msra.mxu1 %v368_v58  ;;  %2892 = vst [vmem:[#allocation26_spill] sm:$0xff] %v2715_v53  ;;  %v2727_v57 = vsub.s32 7, %v2691_v39 }
 0x226   :  { %1466 = vmatprep.subr.mxu0 %v334_v59  ;;  %1537 = vmatprep.subr.mxu1 %v336_v60  ;;  %v2733_v60 = vld [vmem:[#allocation10 + $0x8] sm:$0xff] }
 0x227   :  { %1467 = vmatpush1.msra.mxu0 %v333_v61  ;;  %1538 = vmatpush1.msra.mxu1 %v335_v62  ;;  %v421_v61 = vrot.slane %v2713_v50, %v2702_v46  ;;  %v429_v62 = vrot.slane %v2713_v50, %v2705_v47 }
 0x228   :  { %1468 = vmatprep.subr.mxu0 %v301_v63  ;;  %1539 = vmatprep.subr.mxu1 %v303_v1  ;;  %v425_v63 = vrot.slane %v2713_v50, %v2708_v48  ;;  %v433_v1 = vrot.slane %v2713_v50, %v2711_v49 }
 0x229   :  { %1469 = vmatpush1.msra.mxu0 %v300_v2  ;;  %1502 = vmatprep.mubr.f32.mxu0 %v2877_v0 }
 0x22a   :  { %1540 = vmatpush1.msra.mxu1 %v302_v3  ;;  %1573 = vmatprep.mubr.f32.mxu1 %v2877_v0 }
 0x22b   :  { %2242 = vmatmul.mubr.msk.f32.vlgmr.msra.gmra.mxu0 %vm201_vm2, %v2601_v36  ;;  %2243 = vmatmul.mubr.msk.f32.vlgmr.msra.gmra.mxu1 %vm201_vm2, %v2601_v36 }
 0x22c   :  { %1604 = vmatprep.subr.mxu0 %v404_v4  ;;  %1675 = vmatprep.subr.mxu1 %v406_v5  ;;  %v2744_v4 = vsub.s32 %v1795_v51, %v2691_v39 }
 0x22d   :  { %1605 = vmatpush1.msra.mxu0 %v403_v6  ;;  %1676 = vmatpush1.msra.mxu1 %v405_v7  ;;  %v437_v6 = vrot.slane %v2713_v50, %v2718_v54  ;;  %v445_v7 = vrot.slane %v2713_v50, %v2721_v55 }
 0x22e   :  { %1606 = vmatprep.subr.mxu0 %v371_v8  ;;  %1677 = vmatprep.subr.mxu1 %v373_v9  ;;  %2893 = vst [vmem:[#allocation27_spill] sm:$0xff] %v2744_v4  ;;  %v410_v8 = vld [vmem:[#allocation10 + $0x10] sm:$0xff]  ;;  %v441_v9 = vrot.slane %v2713_v50, %v2724_v56 }
 0x22f   :  { %1607 = vmatpush1.msra.mxu0 %v370_v10  ;;  %1678 = vmatpush1.msra.mxu1 %v372_v11  ;;  %v449_v10 = vrot.slane %v2713_v50, %v2727_v57  ;;  %v453_v11 = vrot.slane %v2733_v60, %v2702_v46  ;;  %v489_v43 = vrot.slane %v410_v8, %v2708_v48 }
 0x230   :  { %1608 = vmatprep.subr.mxu0 %v338_v12  ;;  %1679 = vmatprep.subr.mxu1 %v340_v13  ;;  %v461_v12 = vrot.slane %v2733_v60, %v2705_v47  ;;  %v457_v13 = vrot.slane %v2733_v60, %v2708_v48  ;;  %v497_v50 = vrot.slane %v410_v8, %v2711_v49 }
 0x231   :  { %1609 = vmatpush1.msra.mxu0 %v337_v14  ;;  %1680 = vmatpush1.msra.mxu1 %v339_v15  ;;  %v465_v14 = vrot.slane %v2733_v60, %v2711_v49  ;;  %v469_v15 = vrot.slane %v2733_v60, %v2718_v54  ;;  %v501_v51 = vrot.slane %v410_v8, %v2718_v54 }
 0x232   :  { %1610 = vmatprep.subr.mxu0 %v305_v16  ;;  %1681 = vmatprep.subr.mxu1 %v307_v17  ;;  %v477_v16 = vrot.slane %v2733_v60, %v2721_v55  ;;  %v473_v17 = vrot.slane %v2733_v60, %v2724_v56  ;;  %v509_v52 = vrot.slane %v410_v8, %v2721_v55 }
 0x233   :  { %1611 = vmatpush1.msra.mxu0 %v304_v18  ;;  %1644 = vmatprep.mubr.f32.mxu0 %v2877_v0  ;;  %v481_v18 = vrot.slane %v2733_v60, %v2727_v57  ;;  %v505_v60 = vrot.slane %v410_v8, %v2724_v56 }
 0x234   :  { %1682 = vmatpush1.msra.mxu1 %v306_v19  ;;  %1715 = vmatprep.mubr.f32.mxu1 %v2877_v0  ;;  %v485_v19 = vrot.slane %v410_v8, %v2702_v46 }
 0x235   :  { %2244 = vmatmul.mubr.msk.f32.vlgmr.msra.gmra.mxu0 %vm201_vm2, %v2601_v36  ;;  %2245 = vmatmul.mubr.msk.f32.vlgmr.msra.gmra.mxu1 %vm201_vm2, %v2601_v36 }
 0x236   :  { %2287 = vmatprep.subr.mxu0 %v2877_v0  ;;  %2295 = vmatprep.mubr.msk.f32.mxu0 %vm2509_vm0, %v2877_v0 }
 0x237   :  { %2288 = vmatpush3.msra.mxu0 %v407_v20  ;;  %2298 = vmatprep.subr.mxu1 %v2877_v0  ;;  %v493_v20 = vrot.slane %v410_v8, %v2705_v47 }
 0x238   :  { %2289 = vmatprep.subr.mxu0 %v2877_v0  ;;  %2306 = vmatprep.mubr.msk.f32.mxu1 %vm2509_vm0, %v2877_v0 }
 0x239   :  { %2290 = vmatpush3.msra.mxu0 %v374_v21 }
 0x23a   :  { %2291 = vmatprep.subr.mxu0 %v2877_v0 }
 0x23b   :  { %2292 = vmatpush3.msra.mxu0 %v341_v22 }
 0x23c   :  { %2293 = vmatprep.subr.mxu0 %v2877_v0 }
 0x23d   :  { %2294 = vmatpush3.msra.mxu0 %v308_v23  ;;  %v2773_v23 = vld [vmem:[#allocation10 + $0x18] sm:$0xff] }
 0x23e   :  { %2296 = vmatmul.mubr.msk.f32.vlgmr.msra.gmra.mxu0 %vm201_vm2, %v2601_v36  ;;  %2309 = vmatprep.subr.mxu0 %v2877_v0 }
 0x23f   :  { %2317 = vmatprep.mubr.msk.f32.mxu0 %vm2509_vm0, %v2877_v0  ;;  %v513_v0 = vrot.slane %v410_v8, %v2727_v57  ;;  %v541_v8 = vrot.slane %v2773_v23, %v2721_v55 }
 0x2b0   :  { %v2663_v24 = vpop.f32.mrf.mxu0  ;;  %v2665_v25 = vpop.f32.mrf.mxu1 }
 0x2b1   :  { %v2776_v35 = vadd.f32 %v2663_v24, %v421_v61  ;;  %v2779_v42 = vadd.f32 %v2665_v25, %v429_v62  ;;  %v517_v24 = vrot.slane %v2773_v23, %v2702_v46  ;;  %v525_v25 = vrot.slane %v2773_v23, %v2705_v47 }
 0x2b2   :  { %v2667_v26 = vpop.f32.mrf.mxu0  ;;  %v2669_v27 = vpop.f32.mrf.mxu1  ;;  %v521_v61 = vrot.slane %v2773_v23, %v2708_v48  ;;  %v529_v62 = vrot.slane %v2773_v23, %v2711_v49  ;;  %v537_v46 = vrot.slane %v2773_v23, %v2724_v56  ;;  %v545_v47 = vrot.slane %v2773_v23, %v2727_v57 }
 0x2b3   :  { %v2809_v49 = vadd.f32 %v2669_v27, %v433_v1 }
 0x2b9   :  { %v2671_v28 = vpop.f32.mrf.mxu0  ;;  %v2673_v29 = vpop.f32.mrf.mxu1 }
 0x2ba   :  { %2885 = vst [vmem:[#allocation19_spill] sm:$0xff] %v2671_v28  ;;  %2886 = vst [vmem:[#allocation20_spill] sm:$0xff] %v2673_v29 }
 0x2bb   :  { %v2675_v30 = vpop.f32.mrf.mxu0  ;;  %v2677_v36 = vpop.f32.mrf.mxu1 }
 0x2bc   :  { %v868_v29 = vadd.f32 %v2677_v36, %v449_v10 }
 0x2c3   :  { %v2679_v31 = vpop.f32.mrf.mxu0  ;;  %v2681_v32 = vpop.f32.mrf.mxu1 }
 0x2c4   :  { %2887 = vst [vmem:[#allocation21_spill] sm:$0xff] %v2679_v31  ;;  %2888 = vst [vmem:[#allocation22_spill] sm:$0xff] %v2681_v32  ;;  %v533_v32 = vrot.slane %v2773_v23, %v2718_v54  ;;  %v2806_v31 = vadd.f32 %v2667_v26, %v425_v63  ;;  %v797_v54 = vadd.f32 %v2675_v30, %v441_v9 }
 0x2c5   :  { %v2683_v33 = vpop.f32.mrf.mxu0  ;;  %v2685_v34 = vpop.f32.mrf.mxu1 }
 0x2c6   :  { %v939_v55 = vadd.f32 %v2683_v33, %v457_v13 }
 0x2cd   :  { %v2687_v37 = vpop.f32.mrf.mxu0  ;;  %v2689_v38 = vpop.f32.mrf.mxu1 }
 0x2ce   :  { %v1079_v57 = vadd.f32 %v2687_v37, %v469_v15 }
 0x2cf   :  { %v2693_v40 = vpop.f32.mrf.mxu0  ;;  %v2695_v41 = vpop.f32.mrf.mxu1 }
 0x2d0   :  { %v1081_v26 = vadd.f32 %v2693_v40, %v473_v17  ;;  %v1152_v63 = vadd.f32 %v2695_v41, %v481_v18  ;;  %v2896_v40 = vld [vmem:[#allocation20_spill] sm:$0xff]  ;;  %v1816_v41 = vcombine.low %v797_v54, %v868_v29 }
 0x2d7   :  { %v2697_v44 = vpop.f32.mrf.mxu0  ;;  %v2699_v45 = vpop.f32.mrf.mxu1 }
 0x2d8   :  { %2890 = vst [vmem:[#allocation24_spill] sm:$0xff] %v2699_v45  ;;  %v1010_v45 = vadd.f32 %v2685_v34, %v465_v14  ;;  %v1221_v34 = vadd.f32 %v2697_v44, %v485_v19  ;;  %v866_v14 = vadd.f32 %v2896_v40, %v445_v7 }
 0x2d9   :  { %v2729_v58 = vpop.f32.mrf.mxu0  ;;  %v2731_v59 = vpop.f32.mrf.mxu1 }
 0x2da   :  { %v1223_v27 = vadd.f32 %v2729_v58, %v489_v43  ;;  %v1294_v30 = vadd.f32 %v2731_v59, %v497_v50  ;;  %v2897_v58 = vld [vmem:[#allocation21_spill] sm:$0xff]  ;;  %v2898_v59 = vld [vmem:[#allocation22_spill] sm:$0xff] }
 0x2db   :  { %v937_v17 = vadd.f32 %v2897_v58, %v453_v11 }
 0x2df   :  { %v2894_v10 = vld [vmem:[#allocation24_spill] sm:$0xff] }
 0x2e0   :  { %v1292_v37 = vadd.f32 %v2894_v10, %v493_v20  ;;  %v1850_v20 = vcombine.low %v939_v55, %v1010_v45 }
 0x2e1   :  { %v1362_v2 = vpop.f32.mrf.mxu0  ;;  %v1433_v3 = vpop.f32.mrf.mxu1 }
 0x2e2   :  { %v1363_v1 = vadd.f32 %v1362_v2, %v501_v51  ;;  %v1434_v36 = vadd.f32 %v1433_v3, %v509_v52  ;;  %v1008_v2 = vadd.f32 %v2898_v59, %v461_v12  ;;  %v1866_v3 = vcombine.low %v1081_v26, %v1152_v63 }
 0x2e3   :  { %v1364_v21 = vpop.f32.mrf.mxu0  ;;  %v1435_v22 = vpop.f32.mrf.mxu1  ;;  %v1800_v51 = vcombine.low %v2806_v31, %v2809_v49 }
 0x2e4   :  { %v1365_v28 = vadd.f32 %v1364_v21, %v505_v60  ;;  %v1436_v56 = vadd.f32 %v1435_v22, %v513_v0  ;;  %v1150_v0 = vadd.f32 %v2689_v38, %v477_v16  ;;  %v1908_v38 = vcombine.low %v1363_v1, %v1434_v36 }
 0x2e5   :  { %v1892_v21 = vcombine.low %v1221_v34, %v1292_v37  ;;  %v1842_v60 = vcombine.low %v937_v17, %v1008_v2 }
 0x2eb   :  { %v1504_v5 = vpop.f32.mrf.mxu0  ;;  %v1575_v53 = vpop.f32.mrf.mxu1 }
 0x2ec   :  { %v1505_v9 = vadd.f32 %v1504_v5, %v517_v24  ;;  %v1576_v33 = vadd.f32 %v1575_v53, %v525_v25  ;;  %v1900_v5 = vcombine.low %v1223_v27, %v1294_v30 }
 0x2ed   :  { %v1506_v39 = vpop.f32.mrf.mxu0  ;;  %v1577_v4 = vpop.f32.mrf.mxu1 }
 0x2ee   :  { %v1507_v23 = vadd.f32 %v1506_v39, %v521_v61  ;;  %v1578_v48 = vadd.f32 %v1577_v4, %v529_v62  ;;  %v1916_v39 = vcombine.low %v1365_v28, %v1436_v56  ;;  %v2895_v4 = vld [vmem:[#allocation19_spill] sm:$0xff]  ;;  %v1942_v16 = vcombine.low %v1505_v9, %v1576_v33 }
 0x2ef   :  { %v795_v13 = vadd.f32 %v2895_v4, %v437_v6  ;;  %v1858_v28 = vcombine.low %v1079_v57, %v1150_v0  ;;  %v2899_v6 = vld [vmem:[#allocation27_spill] sm:$0xff]  ;;  %v2901_v57 = vld [vmem:[#allocation26_spill] sm:$0xff]  ;;  %v2903_v33 = vcombine.low %v2776_v35, %v2779_v42 }
 0x2f0   :  { %v1950_v15 = vcombine.low %v1507_v23, %v1578_v48  ;;  %v1923_v22 = vrot.slane %v1916_v39, %v2899_v6  ;;  %v1907_v45 = vrot.slane %v1900_v5, %v2899_v6  ;;  %v1915_v24 = vrot.slane %v1908_v38, %v2899_v6  ;;  %v2900_v56 = vld [vmem:[#allocation23_spill] sm:$0xff] }
 0x2f1   :  { %v1808_v52 = vcombine.low %v795_v13, %v866_v14  ;;  %v1949_v25 = vrot.slane %v1942_v16, %v2899_v6  ;;  %v1823_v62 = vrot.slane %v1816_v41, %v2899_v6  ;;  %v1807_v55 = vrot.slane %v1800_v51, %v2899_v6  ;;  %v1992_v16 = vld [vmem:[#allocation11] sm:$0xff] }
 0x2f2   :  { %v1957_v43 = vrot.slane %v1950_v15, %v2899_v6  ;;  %v1932_v31 = vcombine.low %v1915_v24, %v1923_v22  ;;  %v2902_v23 = vunpack.c.0.s8 %v2901_v57  ;;  %v1849_v27 = vrot.slane %v1842_v60, %v2899_v6 }
 0x2f3   :  { %v1815_v63 = vrot.slane %v1808_v52, %v2899_v6  ;;  %v1799_v0 = vrot.slane %v2903_v33, %v2899_v6  ;;  %v2904_v5 = vmov 0.0  }
 0x2f4   :  { %v1974_v48 = vcombine.low %v1949_v25, %v1957_v43  ;;  %v1830_v26 = vsub.s32 %v2902_v23, %v2900_v56 }
 0x2f5   :  { %v1646_v53 = vpop.f32.mrf.mxu0  ;;  %v1717_v18 = vpop.f32.mrf.mxu1  ;;  %v1832_v34 = vcombine.low %v1815_v63, %v1823_v62  ;;  %v1824_v40 = vcombine.low %v1799_v0, %v1807_v55 }
 0x2f6   :  { %v1647_v44 = vadd.f32 %v1646_v53, %v533_v32  ;;  %v1718_v19 = vadd.f32 %v1717_v18, %v541_v8  ;;  %v1873_v32 = vrot.slane %v1866_v3, %v2899_v6  ;;  %v1857_v8 = vrot.slane %v1850_v20, %v2899_v6 }
 0x2f7   :  { %v1648_v7 = vpop.f32.mrf.mxu0  ;;  %v1719_v29 = vpop.f32.mrf.mxu1  ;;  %v1939_v37 = vrot.slane %v1932_v31, %v1830_v26  ;;  %v1981_v39 = vrot.slane %v1974_v48, %v1830_v26  ;;  %v1839_v17 = vrot.slane %v1832_v34, %v1830_v26  ;;  %v1831_v35 = vrot.slane %v1824_v40, %v1830_v26 }
 0x2f8   :  { %v1958_v11 = vcombine.low %v1647_v44, %v1718_v19  ;;  %v1649_v50 = vadd.f32 %v1648_v7, %v537_v46  ;;  %v1720_v12 = vadd.f32 %v1719_v29, %v545_v47  ;;  %v1865_v46 = vrot.slane %v1858_v28, %v2899_v6  ;;  %v1993_v44 = vld [vmem:[#allocation11 + $0x8] sm:$0xff] }
 0x2f9   :  { %v1899_v47 = vrot.slane %v1892_v21, %v2899_v6  ;;  %v1874_v10 = vcombine.low %v1849_v27, %v1857_v8  ;;  %v1840_v18 = vcombine.low %v1831_v35, %v1839_v17  ;;  %v1841_v38 = vcombine.high %v1831_v35, %v1839_v17  ;;  %v2229_v21 = vld [vmem:[#allocation10 + $0x20] ss:$0 sm:$0xff] }
 0x2fa   :  { %v1966_v61 = vcombine.low %v1649_v50, %v1720_v12  ;;  %v1965_v49 = vrot.slane %v1958_v11, %v2899_v6  ;;  %v1882_v30 = vcombine.low %v1865_v46, %v1873_v32  ;;  %v2512_v19 = vmov 1966171168   ;;  %v2905_v50 = vld [vmem:[#allocation25_spill] sm:$0xff] }
 0x2fb   :  { %v1924_v1 = vcombine.low %v1899_v47, %v1907_v45  ;;  %v1881_v59 = vrot.slane %v1874_v10, %v1830_v26  ;;  %v1996_v20 = vunpack.c.l.s4 %v2512_v19 }
 0x2fc   :  { %v1973_v54 = vrot.slane %v1966_v61, %v2899_v6  ;;  %v1889_v14 = vrot.slane %v1882_v30, %v1830_v26 }
 0x2fd   :  { %v1931_v41 = vrot.slane %v1924_v1, %v1830_v26  ;;  %v1997_v28 = vunpack.c.0.s8 %v1996_v20 }
 0x2fe   :  { %v1982_v36 = vcombine.low %v1965_v49, %v1973_v54  ;;  %v1788_v9 = vpop.f32.mrf.mxu0  ;;  %v1890_v42 = vcombine.low %v1881_v59, %v1889_v14  ;;  %v1891_v53 = vcombine.high %v1881_v59, %v1889_v14 }
 0x2ff   :  { %v1940_v2 = vcombine.low %v1931_v41, %v1939_v37  ;;  %v1941_v3 = vcombine.high %v1931_v41, %v1939_v37  ;;  %v1789_v6 = vadd.f32 %v2229_v21, %v1788_v9  ;;  %v2000_v22 = vsub.s32 %v1997_v28, %v2900_v56 }
 0x300   :  { %v1989_v4 = vrot.slane %v1982_v36, %v1830_v26  ;;  %v2297_v13 = vpop.f32.mrf.mxu0 }
 0x301   :  { %v2001_v7 = vrot.slane %v1789_v6, %v2000_v22 }
 0x302   :  { %v1990_v15 = vcombine.low %v1981_v39, %v1989_v4  ;;  %v1991_v58 = vcombine.high %v1981_v39, %v1989_v4 }
 0x303   :  { %v2002_v29 = vcombine.high %v2001_v7, %v2001_v7  ;;  %v2009_v43 = vrot.slane %v2001_v7, %v2000_v22 }
 0x304   :  { %2299 = vmatpush3.msra.mxu1 %v1990_v15  ;;  %2310 = vmatpush3.msra.mxu0 %v1991_v58 }
 0x305   :  { %2300 = vmatprep.subr.mxu1 %v2904_v5  ;;  %2311 = vmatprep.subr.mxu0 %v2904_v5  ;;  %v2016_v11 = vrot.slane %v2002_v29, %v2000_v22  ;;  %v2020_v12 = vrot.slane %v2009_v43, %v2905_v50 }
 0x306   :  { %2301 = vmatpush3.msra.mxu1 %v1940_v2  ;;  %2312 = vmatpush3.msra.mxu0 %v1941_v3 }
 0x307   :  { %2302 = vmatprep.subr.mxu1 %v2904_v5  ;;  %2313 = vmatprep.subr.mxu0 %v2904_v5  ;;  %v2024_v32 = vrot.slane %v2016_v11, %v2905_v50 }
 0x308   :  { %2303 = vmatpush3.msra.mxu1 %v1890_v42  ;;  %2314 = vmatpush3.msra.mxu0 %v1891_v53 }
 0x309   :  { %2304 = vmatprep.subr.mxu1 %v2904_v5  ;;  %2315 = vmatprep.subr.mxu0 %v2904_v5 }
 0x30a   :  { %2305 = vmatpush3.msra.mxu1 %v1840_v18  ;;  %2316 = vmatpush3.msra.mxu0 %v1841_v38 }
 0x30b   :  { %2307 = vmatmul.mubr.msk.f32.vlgmr.msra.gmra.mxu1 %vm201_vm2, %v1992_v16  ;;  %2318 = vmatmul.mubr.msk.f32.vlgmr.msra.gmra.mxu0 %vm201_vm2, %v1993_v44 }
 0x3cb   :  { %v2096_v51 = vpop.f32.mrf.mxu1  ;;  %v2169_v52 = vpop.f32.mrf.mxu0 }
 0x3cc   :  { %v2097_v60 = vadd.f32 %v2096_v51, %v2020_v12  ;;  %v2170_v25 = vadd.f32 %v2169_v52, %v2024_v32 }
 0x3cd   :  { %v2308_v45 = vpop.f32.mrf.mxu1  ;;  %v2319_v24 = vpop.f32.mrf.mxu0 }
 0x3ce   :  { %2173 = vadd.xlane.f32.xlu0 %v2097_v60  ;;  %v2177_v61 = vmul.f32 %v2097_v60, %v2097_v60  ;;  %v2178_v62 = vmul.f32 %v2170_v25, %v2170_v25 }
 0x3d0   :  { %2179 = vadd.xlane.f32.xlu1 %v2177_v61 }
 0x3d2   :  { %2175 = vadd.xlane.f32.xlu0 %v2170_v25 }
 0x3d4   :  { %2181 = vadd.xlane.f32.xlu1 %v2178_v62 }
 0x457   :  { %v2174_v8 = vpop.xlane.xlu0 %2173 }
 0x458   :  { %v2183_v46 = vmul.f32 0.03125, %v2174_v8 }
 0x459   :  { %v2180_v47 = vpop.xlane.xlu1 %2179 }
 0x45a   :  { %v2187_v31 = vmul.f32 %v2183_v46, %v2183_v46  ;;  %v2185_v48 = vmul.f32 0.03125, %v2180_v47  ;;  %v2193_v36 = vsub.f32 %v2097_v60, %v2183_v46 }
 0x45b   :  { %v2176_v49 = vpop.xlane.xlu0 %2175 }
 0x45c   :  { %v2189_v54 = vsub.f32 %v2185_v48, %v2187_v31  ;;  %v2184_v55 = vmul.f32 0.03125, %v2176_v49 }
 0x45d   :  { %v2182_v56 = vpop.xlane.xlu1 %2181 }
 0x45e   :  { %v2191_v57 = vmax.f32 %v2189_v54, 0.0  ;;  %v2188_v23 = vmul.f32 %v2184_v55, %v2184_v55  ;;  %v2186_v26 = vmul.f32 0.03125, %v2182_v56  ;;  %v2194_v0 = vsub.f32 %v2170_v25, %v2184_v55 }
 0x460   :  { %v2195_v63 = vadd.f32 1e-05, %v2191_v57  ;;  %v2190_v27 = vsub.f32 %v2186_v26, %v2188_v23 }
 0x462   :  { %2340 = vrsqrt.f32 %v2195_v63  ;;  %v2192_v30 = vmax.f32 %v2190_v27, 0.0 }
 0x464   :  { %v2196_v1 = vadd.f32 1e-05, %v2192_v30 }
 0x466   :  { %2342 = vrsqrt.f32 %v2196_v1 }
 0x46f   :  { %v2341_v9 = vpop.eup %2340 }
 0x470   :  { %v2199_v33 = vmul.f32 %v2341_v9, %v2193_v36 }
 0x472   :  { %2344 = vtanh.f32 %v2199_v33 }
 0x473   :  { %v2343_v34 = vpop.eup %2342 }
 0x474   :  { %v2200_v10 = vmul.f32 %v2343_v34, %v2194_v0 }
 0x476   :  { %2346 = vtanh.f32 %v2200_v10 }
 0x47f   :  { %v2345_v37 = vpop.eup %2344 }
 0x480   :  { %2203 = vst [vmem:[#allocation13] sm:$0xff] %v2345_v37 }
 0x483   :  { %v2347_v39 = vpop.eup %2346 }
 0x484   :  { %2204 = vst [vmem:[#allocation13 + $0x8] sm:$0xff] %v2347_v39 }
 0x485   :  { %2479 = shalt.err (!%p2476_p6)
}
 0x486   :  { %2216 = dma.vmem_to_hbm [thread:$0]  %s2211_s15, 256, %s2876_s8, [#allocation4], %s2504_s3, %s2504_s3, %s2505_s24  }
 0x487   :  { %2496 = dma.done.wait [#allocation4], 256  }
 0x488   :  { %2497 = vsyncadd [#allocation4], 4294967040 }
 0x489   :  { %2220 = vsyncpa [#allocation3], 1 }
 0x48a   :  { %2221 = vsyncpa [#allocation6], 1 }
 0x48b   :  { %2222 = vsyncpa [#allocation9], 1 }
 0x48c   :  { %2223 = vsyncpa [#allocation12], 1 }
 0x48d   :  { %2224 = vsyncpa [#allocation4], 1 }

// kernel: tpu_custom_call.1
= control target key start
LH: loop header
LB: loop body
LE: loop exit
PB: predicated region body
PF: predicated region fallthrough
CT: control target
= control target key end

     0   :  { %13 = vsyncpa [#allocation3], 0  ;;  %s2868_s0 = inlined_call_operand.hbm [shape: f32[2,8], index: 0, kind: input, shape index: {}]   ;;  %s2869_s1 = inlined_call_operand.hbm [shape: f32[8,32], index: 1, kind: input, shape index: {}]   ;;  %s2870_s2 = inlined_call_operand.hbm [shape: f32[32,32], index: 2, kind: input, shape index: {}]   ;;  %s2871_s3 = inlined_call_operand.hbm [shape: f32[32,4224], index: 3, kind: input, shape index: {}]   ;;  %s2872_s4 = inlined_call_operand.vmem [shape: f32[1,32], index: 4, kind: input, shape index: {}]   ;;  %s2873_s5 = inlined_call_operand.vmem [shape: f32[1,32], index: 5, kind: input, shape index: {}]   ;;  %s2874_s6 = inlined_call_operand.hbm [shape: f32[1,4224], index: 6, kind: input, shape index: {}]   ;;  %s2875_s7 = inlined_call_operand.hbm [shape: f32[2,8,32], index: 7, kind: input, shape index: {}]   ;;  %s2876_s8 = inlined_call_operand.hbm [shape: f32[2,8,128], index: 8, kind: output, shape index: {}]  }
   0x1   :  { %14 = vsyncpa [#allocation6], 0 }
   0x2   :  { %15 = vsyncpa [#allocation9], 0 }
   0x3   :  { %16 = vsyncpa [#allocation12], 0 }
   0x4   :  { %17 = vsyncpa [#allocation4], 0  ;;  %s2498_s27 = smov [#allocation5]   ;;  %s2499_s29 = smov [#allocation8]  }
   0x5   :  { %s34_s28 = sshll.u32 %s2498_s27, 4  ;;  %s55_s30 = sshll.u32 %s2499_s29, 4  ;;  %s35_s28 = int_to_ptr.vmem [resolvable:$true] %s34_s28  ;;  %s56_s30 = int_to_ptr.vmem [resolvable:$true] %s55_s30 }
   0x6   :  { %s2356_s9 = scalar_lea.vmem %s35_s28, 128  ;;  %p2361_p1 = scmp.lt.s32.totalorder %s35_s28, %s35_s28 }
   0x7   :  { %p2357_p0 = scmp.ne.s32.totalorder %s35_s28, %s2356_s9  ;;  %p2362_p2 = scmp.lt.s32.totalorder %s2356_s9, %s2356_s9 }
   0x9   :  { %p2363_p3 = por %p2362_p2, %p2361_p1 }
   0xb   :  { %p2364_p4 = pnand %p2363_p3, %p2357_p0 }
   0xd   :  { %2367 = shalt.err (!%p2364_p4)
}
   0xe   :  { %37 = dma.hbm_to_vmem [thread:$0]  %s2869_s1, 128, %s35_s28, [#allocation6]  }
   0xf   :  { %s2376_s12 = scalar_lea.vmem %s56_s30, 16896  ;;  %p2381_p6 = scmp.lt.s32.totalorder %s56_s30, %s56_s30 }
  0x10   :  { %p2377_p5 = scmp.ne.s32.totalorder %s56_s30, %s2376_s12  ;;  %p2382_p7 = scmp.lt.s32.totalorder %s2376_s12, %s2376_s12 }
  0x12   :  { %p2383_p8 = por %p2382_p7, %p2381_p6 }
  0x14   :  { %p2384_p9 = pnand %p2383_p8, %p2377_p5 }
  0x16   :  { %2387 = shalt.err (!%p2384_p9)
}
  0x17   :  { %s2500_s13 = smov 4224   ;;  %s2501_s14 = smov 264  }
  0x18   :  { %61 = dma.hbm_to_vmem [thread:$0]  %s2871_s3, 16896, %s56_s30, [#allocation9], %s2500_s13, %s2500_s13, %s2501_s14  }
  0x19   :  { %s2502_s17 = smov [#allocation2]   ;;  %s2503_s19 = smov [#allocation7]  }
  0x1a   :  { %s24_s18 = sshll.u32 %s2502_s17, 4  ;;  %s43_s20 = sshll.u32 %s2503_s19, 4  ;;  %s25_s18 = int_to_ptr.vmem [resolvable:$true] %s24_s18  ;;  %s44_s20 = int_to_ptr.vmem [resolvable:$true] %s43_s20 }
  0x1b   :  { %s2396_s1 = scalar_lea.vmem %s25_s18, 32  ;;  %p2401_p11 = scmp.lt.s32.totalorder %s25_s18, %s25_s18 }
  0x1c   :  { %p2397_p10 = scmp.ne.s32.totalorder %s25_s18, %s2396_s1  ;;  %p2402_p12 = scmp.lt.s32.totalorder %s2396_s1, %s2396_s1 }
  0x1e   :  { %p2403_p13 = por %p2402_p12, %p2401_p11 }
  0x20   :  { %p2404_p0 = pnand %p2403_p13, %p2397_p10 }
  0x22   :  { %2407 = shalt.err (!%p2404_p0)
}
  0x23   :  { %27 = dma.hbm_to_vmem [thread:$0]  %s2868_s0, 32, %s25_s18, [#allocation3]  }
  0x24   :  { %s2416_s23 = scalar_lea.vmem %s44_s20, 512  ;;  %p2421_p2 = scmp.lt.s32.totalorder %s44_s20, %s44_s20 }
  0x25   :  { %p2417_p1 = scmp.ne.s32.totalorder %s44_s20, %s2416_s23  ;;  %p2422_p3 = scmp.lt.s32.totalorder %s2416_s23, %s2416_s23 }
  0x27   :  { %p2423_p4 = por %p2422_p3, %p2421_p2 }
  0x29   :  { %p2424_p5 = pnand %p2423_p4, %p2417_p1 }
  0x2b   :  { %2427 = shalt.err (!%p2424_p5)
}
  0x2c   :  { %s2504_s3 = smov 128   ;;  %s2505_s24 = smov 8  }
  0x2d   :  { %49 = dma.hbm_to_vmem [thread:$0]  %s2870_s2, 512, %s44_s20, [#allocation6], %s2504_s3, %s2504_s3, %s2505_s24  }
  0x2e   :  { %s2506_s27 = smov [#allocation10]   ;;  %s2507_s29 = smov [#allocation11]  }
  0x2f   :  { %s72_s28 = sshll.u32 %s2506_s27, 4  ;;  %s81_s0 = sshll.u32 %s2507_s29, 4  ;;  %s73_s28 = int_to_ptr.vmem [resolvable:$true] %s72_s28  ;;  %s82_s0 = int_to_ptr.vmem [resolvable:$true] %s81_s0 }
  0x30   :  { %s2436_s30 = scalar_lea.vmem %s73_s28, 528  ;;  %s2440_s9 = scalar_lea.vmem %s73_s28, 544 }
  0x31   :  { %p2437_p6 = scmp.ne.s32.totalorder %s73_s28, %s2436_s30  ;;  %p2441_p7 = scmp.lt.s32.totalorder %s73_s28, %s73_s28 }
  0x32   :  { %p2442_p8 = scmp.lt.s32.totalorder %s2440_s9, %s2436_s30 }
  0x34   :  { %p2443_p9 = por %p2442_p8, %p2441_p7 }
  0x36   :  { %p2444_p10 = pnand %p2443_p9, %p2437_p6 }
  0x38   :  { %2447 = shalt.err (!%p2444_p10)
}
  0x39   :  { %75 = dma.hbm_to_vmem [thread:$0]  %s2874_s6, 528, %s73_s28, [#allocation9]  }
  0x3a   :  { %s2456_s12 = scalar_lea.vmem %s82_s0, 256  ;;  %p2461_p12 = scmp.lt.s32.totalorder %s82_s0, %s82_s0 }
  0x3b   :  { %p2457_p11 = scmp.ne.s32.totalorder %s82_s0, %s2456_s12  ;;  %p2462_p13 = scmp.lt.s32.totalorder %s2456_s12, %s2456_s12 }
  0x3d   :  { %p2463_p0 = por %p2462_p13, %p2461_p12 }
  0x3f   :  { %p2464_p1 = pnand %p2463_p0, %p2457_p11 }
  0x41   :  { %2467 = shalt.err (!%p2464_p1)
}
  0x42   :  { %87 = dma.hbm_to_vmem [thread:$0]  %s2875_s7, 256, %s82_s0, [#allocation12], %s2504_s3, %s2504_s3, %s2505_s24  }
  0x43   :  { %2488 = dma.done.wait [#allocation3], 32  }
  0x44   :  { %2489 = vsyncadd [#allocation3], 4294967264 }
  0x45   :  { %2490 = dma.done.wait [#allocation6], 640  }
  0x46   :  { %2491 = vsyncadd [#allocation6], 4294966656 }
  0x47   :  { %2492 = dma.done.wait [#allocation9], 17424  }
  0x48   :  { %2493 = vsyncadd [#allocation9], 4294949872 }
  0x49   :  { %2494 = dma.done.wait [#allocation12], 256  }
  0x4a   :  { %2495 = vsyncadd [#allocation12], 4294967040  ;;  %v2877_v0 = vmov 0.0   ;;  %vm2509_vm0 = vmmov 0   ;;  %vm115_vm1 = vcmask 64512   ;;  %v107_v1 = vld [vmem:[#allocation5] sm:$0xff] }
  0x4b   :  { %2271 = vmatprep.subr.mxu0 %v2877_v0  ;;  %2273 = vmatprep.mubr.msk.f32.mxu0 %vm2509_vm0, %v2877_v0  ;;  %v106_v2 = vld [vmem:[#allocation2] sm:$0x3]  ;;  %v193_v3 = vld [vmem:[#allocation7 + $0x18] sm:$0xff]  ;;  %v191_v5 = vld [vmem:[#allocation7 + $0x8] sm:$0xff]  ;;  %vm201_vm2 = vcmask 261120  }
  0x4c   :  { %2276 = vmatprep.subr.mxu1 %v2877_v0  ;;  %2284 = vmatprep.mubr.msk.f32.mxu1 %vm2509_vm0, %v2877_v0  ;;  %v192_v4 = vld [vmem:[#allocation7 + $0x10] sm:$0xff]  ;;  %v190_v6 = vld [vmem:[#allocation7] sm:$0xff]  ;;  %v375_v14 = vld [vmem:[#allocation8 + $0x318] sm:$0xff] }
  0x4d   :  { %2272 = vmatpush3.msra.mxu0 %v107_v1  ;;  %2277 = vmatpush3.msra.mxu1 %v193_v3  ;;  %v2225_v7 = vld [vmem:[%s2872_s4] ss:$0 sm:$0xff]  ;;  %v376_v12 = vld [vmem:[#allocation8 + $0x320] sm:$0xff]  ;;  %v377_v15 = vld [vmem:[#allocation8 + $0x328] sm:$0xff] }
  0x4e   :  { %2274 = vmatmul.mubr.msk.f32.vlgmr.msra.gmra.mxu0 %vm115_vm1, %v106_v2  ;;  %2278 = vmatprep.subr.mxu1 %v2877_v0  ;;  %v378_v13 = vld [vmem:[#allocation8 + $0x330] sm:$0xff]  ;;  %v343_v16 = vld [vmem:[#allocation8 + $0x218] sm:$0xff]  ;;  %v345_v17 = vld [vmem:[#allocation8 + $0x228] sm:$0xff] }
  0x4f   :  { %650 = vmatprep.mubr.f32.mxu0 %v2877_v0  ;;  %2279 = vmatpush3.msra.mxu1 %v192_v4  ;;  %v342_v18 = vld [vmem:[#allocation8 + $0x210] sm:$0xff]  ;;  %v344_v19 = vld [vmem:[#allocation8 + $0x220] sm:$0xff]  ;;  %v309_v22 = vld [vmem:[#allocation8 + $0x108] sm:$0xff] }
  0x50   :  { %2280 = vmatprep.subr.mxu1 %v2877_v0  ;;  %610 = vmatprep.subr.mxu0 %v376_v12  ;;  %v310_v20 = vld [vmem:[#allocation8 + $0x110] sm:$0xff]  ;;  %v312_v21 = vld [vmem:[#allocation8 + $0x120] sm:$0xff]  ;;  %v311_v23 = vld [vmem:[#allocation8 + $0x118] sm:$0xff] }
  0x51   :  { %2281 = vmatpush3.msra.mxu1 %v191_v5  ;;  %611 = vmatpush1.msra.mxu0 %v375_v14  ;;  %v277_v24 = vld [vmem:[#allocation8 + $0x8] sm:$0xff]  ;;  %v279_v25 = vld [vmem:[#allocation8 + $0x18] sm:$0xff]  ;;  %v276_v26 = vld [vmem:[#allocation8] sm:$0xff] }
  0x52   :  { %2282 = vmatprep.subr.mxu1 %v2877_v0  ;;  %612 = vmatprep.subr.mxu0 %v343_v16  ;;  %v278_v27 = vld [vmem:[#allocation8 + $0x10] sm:$0xff]  ;;  %v380_v28 = vld [vmem:[#allocation8 + $0x340] sm:$0xff]  ;;  %v379_v34 = vld [vmem:[#allocation8 + $0x338] sm:$0xff] }
  0x53   :  { %2283 = vmatpush3.msra.mxu1 %v190_v6  ;;  %613 = vmatpush1.msra.mxu0 %v342_v18  ;;  %v382_v29 = vld [vmem:[#allocation8 + $0x350] sm:$0xff]  ;;  %v381_v35 = vld [vmem:[#allocation8 + $0x348] sm:$0xff]  ;;  %v347_v37 = vld [vmem:[#allocation8 + $0x238] sm:$0xff] }
  0x54   :  { %681 = vmatprep.subr.mxu1 %v378_v13  ;;  %614 = vmatprep.subr.mxu0 %v310_v20  ;;  %v2227_v30 = vld [vmem:[%s2873_s5] ss:$0 sm:$0xff]  ;;  %v349_v38 = vld [vmem:[#allocation8 + $0x248] sm:$0xff]  ;;  %v348_v40 = vld [vmem:[#allocation8 + $0x240] sm:$0xff]  ;;  %s2513_s5 = smov [#allocation13]  }
  0x55   :  { %615 = vmatpush1.msra.mxu0 %v309_v22  ;;  %v346_v39 = vld [vmem:[#allocation8 + $0x230] sm:$0xff]  ;;  %v316_v42 = vld [vmem:[#allocation8 + $0x140] sm:$0xff]  ;;  %v313_v43 = vld [vmem:[#allocation8 + $0x128] sm:$0xff]  ;;  %s2210_s15 = sshll.u32 %s2513_s5, 4  ;;  %s2211_s15 = int_to_ptr.vmem [resolvable:$true] %s2210_s15 }
  0x56   :  { %616 = vmatprep.subr.mxu0 %v277_v24  ;;  %v314_v41 = vld [vmem:[#allocation8 + $0x130] sm:$0xff]  ;;  %v315_v44 = vld [vmem:[#allocation8 + $0x138] sm:$0xff]  ;;  %v281_v45 = vld [vmem:[#allocation8 + $0x28] sm:$0xff]  ;;  %s2468_s16 = scalar_lea.vmem %s2211_s15, 256  ;;  %p2473_p3 = scmp.lt.s32.totalorder %s2211_s15, %s2211_s15 }
  0x57   :  { %617 = vmatpush1.msra.mxu0 %v276_v26  ;;  %v283_v46 = vld [vmem:[#allocation8 + $0x38] sm:$0xff]  ;;  %v280_v47 = vld [vmem:[#allocation8 + $0x20] sm:$0xff]  ;;  %v282_v48 = vld [vmem:[#allocation8 + $0x30] sm:$0xff]  ;;  %p2469_p2 = scmp.ne.s32.totalorder %s2211_s15, %s2468_s16  ;;  %p2474_p4 = scmp.lt.s32.totalorder %s2468_s16, %s2468_s16 }
  0x58   :  { %752 = vmatprep.subr.mxu0 %v380_v28  ;;  %v384_v49 = vld [vmem:[#allocation8 + $0x360] sm:$0xff]  ;;  %v386_v50 = vld [vmem:[#allocation8 + $0x370] sm:$0xff]  ;;  %v383_v51 = vld [vmem:[#allocation8 + $0x358] sm:$0xff] }
  0x59   :  { %v385_v52 = vld [vmem:[#allocation8 + $0x368] sm:$0xff]  ;;  %v351_v53 = vld [vmem:[#allocation8 + $0x258] sm:$0xff]  ;;  %v350_v55 = vld [vmem:[#allocation8 + $0x250] sm:$0xff]  ;;  %p2475_p5 = por %p2474_p4, %p2473_p3 }
  0x5a   :  { %v353_v54 = vld [vmem:[#allocation8 + $0x268] sm:$0xff]  ;;  %v352_v56 = vld [vmem:[#allocation8 + $0x260] sm:$0xff]  ;;  %v318_v57 = vld [vmem:[#allocation8 + $0x150] sm:$0xff] }
  0x5b   :  { %v320_v58 = vld [vmem:[#allocation8 + $0x160] sm:$0xff]  ;;  %v317_v59 = vld [vmem:[#allocation8 + $0x148] sm:$0xff]  ;;  %v319_v60 = vld [vmem:[#allocation8 + $0x158] sm:$0xff]  ;;  %p2476_p6 = pnand %p2475_p5, %p2469_p2 }
  0x5c   :  { %v285_v61 = vld [vmem:[#allocation8 + $0x48] sm:$0xff]  ;;  %v287_v62 = vld [vmem:[#allocation8 + $0x58] sm:$0xff]  ;;  %v284_v63 = vld [vmem:[#allocation8 + $0x40] sm:$0xff] }
  0x5d   :  { %v286_v1 = vld [vmem:[#allocation8 + $0x50] sm:$0xff]  ;;  %v388_v2 = vld [vmem:[#allocation8 + $0x380] sm:$0xff]  ;;  %v387_v4 = vld [vmem:[#allocation8 + $0x378] sm:$0xff] }
  0x5e   :  { %v390_v3 = vld [vmem:[#allocation8 + $0x390] sm:$0xff]  ;;  %v389_v5 = vld [vmem:[#allocation8 + $0x388] sm:$0xff]  ;;  %v355_v6 = vld [vmem:[#allocation8 + $0x278] sm:$0xff] }
  0x5f   :  { %v321_v12 = vld [vmem:[#allocation8 + $0x168] sm:$0xff]  ;;  %v323_v13 = vld [vmem:[#allocation8 + $0x178] sm:$0xff]  ;;  %v288_v16 = vld [vmem:[#allocation8 + $0x60] sm:$0xff] }
  0x60   :  { %v289_v14 = vld [vmem:[#allocation8 + $0x68] sm:$0xff]  ;;  %v392_v18 = vld [vmem:[#allocation8 + $0x3a0] sm:$0xff]  ;;  %v391_v20 = vld [vmem:[#allocation8 + $0x398] sm:$0xff] }
  0x61   :  { %v359_v22 = vld [vmem:[#allocation8 + $0x298] sm:$0xff]  ;;  %v358_v24 = vld [vmem:[#allocation8 + $0x290] sm:$0xff]  ;;  %v325_v28 = vld [vmem:[#allocation8 + $0x188] sm:$0xff] }
  0x62   :  { %v326_v26 = vld [vmem:[#allocation8 + $0x190] sm:$0xff] }
 0x10e   :  { %v185_v8 = vpop.f32.mrf.mxu0 }
 0x10f   :  { %v186_v9 = vadd.f32 %v2225_v7, %v185_v8  ;;  %v357_v7 = vld [vmem:[#allocation8 + $0x288] sm:$0xff]  ;;  %v354_v8 = vld [vmem:[#allocation8 + $0x270] sm:$0xff] }
 0x110   :  { %v2275_v10 = vpop.f32.mrf.mxu0 }
 0x111   :  { %2336 = vtanh.f32 %v186_v9  ;;  %v356_v9 = vld [vmem:[#allocation8 + $0x280] sm:$0xff]  ;;  %v322_v10 = vld [vmem:[#allocation8 + $0x170] sm:$0xff] }
 0x11e   :  { %v2337_v11 = vpop.eup %2336 }
 0x11f   :  { %2285 = vmatmul.mubr.msk.f32.vlgmr.msra.gmra.mxu1 %vm201_vm2, %v2337_v11  ;;  %v324_v11 = vld [vmem:[#allocation8 + $0x180] sm:$0xff] }
 0x120   :  { %721 = vmatprep.mubr.f32.mxu1 %v2877_v0  ;;  %682 = vmatpush1.msra.mxu1 %v377_v15  ;;  %v291_v15 = vld [vmem:[#allocation8 + $0x78] sm:$0xff] }
 0x121   :  { %683 = vmatprep.subr.mxu1 %v345_v17  ;;  %v290_v17 = vld [vmem:[#allocation8 + $0x70] sm:$0xff] }
 0x122   :  { %684 = vmatpush1.msra.mxu1 %v344_v19  ;;  %v394_v19 = vld [vmem:[#allocation8 + $0x3b0] sm:$0xff] }
 0x123   :  { %685 = vmatprep.subr.mxu1 %v312_v21  ;;  %v393_v21 = vld [vmem:[#allocation8 + $0x3a8] sm:$0xff] }
 0x124   :  { %686 = vmatpush1.msra.mxu1 %v311_v23  ;;  %v361_v23 = vld [vmem:[#allocation8 + $0x2a8] sm:$0xff] }
 0x125   :  { %687 = vmatprep.subr.mxu1 %v279_v25  ;;  %v360_v25 = vld [vmem:[#allocation8 + $0x2a0] sm:$0xff] }
 0x126   :  { %688 = vmatpush1.msra.mxu1 %v278_v27  ;;  %v328_v27 = vld [vmem:[#allocation8 + $0x1a0] sm:$0xff] }
 0x127   :  { %823 = vmatprep.subr.mxu1 %v382_v29  ;;  %v327_v29 = vld [vmem:[#allocation8 + $0x198] sm:$0xff] }
 0x1df   :  { %v271_v31 = vpop.f32.mrf.mxu1 }
 0x1e0   :  { %v272_v32 = vadd.f32 %v2227_v30, %v271_v31  ;;  %v293_v30 = vld [vmem:[#allocation8 + $0x88] sm:$0xff]  ;;  %v295_v31 = vld [vmem:[#allocation8 + $0x98] sm:$0xff] }
 0x1e1   :  { %v2286_v33 = vpop.f32.mrf.mxu1 }
 0x1e2   :  { %2338 = vtanh.f32 %v272_v32  ;;  %v292_v32 = vld [vmem:[#allocation8 + $0x80] sm:$0xff]  ;;  %v294_v33 = vld [vmem:[#allocation8 + $0x90] sm:$0xff] }
 0x1ef   :  { %v2601_v36 = vpop.eup %2338 }
 0x1f0   :  { %2230 = vmatmul.mubr.msk.f32.vlgmr.msra.gmra.mxu0 %vm201_vm2, %v2601_v36  ;;  %2231 = vmatmul.mubr.msk.f32.vlgmr.msra.gmra.mxu1 %vm201_vm2, %v2601_v36 }
 0x1f1   :  { %753 = vmatpush1.msra.mxu0 %v379_v34  ;;  %824 = vmatpush1.msra.mxu1 %v381_v35  ;;  %v396_v34 = vld [vmem:[#allocation8 + $0x3c0] sm:$0xff]  ;;  %v398_v35 = vld [vmem:[#allocation8 + $0x3d0] sm:$0xff] }
 0x1f2   :  { %754 = vmatprep.subr.mxu0 %v347_v37  ;;  %825 = vmatprep.subr.mxu1 %v349_v38  ;;  %v395_v37 = vld [vmem:[#allocation8 + $0x3b8] sm:$0xff]  ;;  %v397_v38 = vld [vmem:[#allocation8 + $0x3c8] sm:$0xff] }
 0x1f3   :  { %755 = vmatpush1.msra.mxu0 %v346_v39  ;;  %826 = vmatpush1.msra.mxu1 %v348_v40  ;;  %v363_v39 = vld [vmem:[#allocation8 + $0x2b8] sm:$0xff]  ;;  %v365_v40 = vld [vmem:[#allocation8 + $0x2c8] sm:$0xff] }
 0x1f4   :  { %756 = vmatprep.subr.mxu0 %v314_v41  ;;  %827 = vmatprep.subr.mxu1 %v316_v42  ;;  %v362_v41 = vld [vmem:[#allocation8 + $0x2b0] sm:$0xff]  ;;  %v364_v42 = vld [vmem:[#allocation8 + $0x2c0] sm:$0xff] }
 0x1f5   :  { %757 = vmatpush1.msra.mxu0 %v313_v43  ;;  %828 = vmatpush1.msra.mxu1 %v315_v44  ;;  %v330_v43 = vld [vmem:[#allocation8 + $0x1b0] sm:$0xff]  ;;  %v332_v44 = vld [vmem:[#allocation8 + $0x1c0] sm:$0xff] }
 0x1f6   :  { %758 = vmatprep.subr.mxu0 %v281_v45  ;;  %829 = vmatprep.subr.mxu1 %v283_v46  ;;  %v329_v45 = vld [vmem:[#allocation8 + $0x1a8] sm:$0xff]  ;;  %v331_v46 = vld [vmem:[#allocation8 + $0x1b8] sm:$0xff] }
 0x1f7   :  { %759 = vmatpush1.msra.mxu0 %v280_v47  ;;  %792 = vmatprep.mubr.f32.mxu0 %v2877_v0  ;;  %v297_v47 = vld [vmem:[#allocation8 + $0xa8] sm:$0xff] }
 0x1f8   :  { %830 = vmatpush1.msra.mxu1 %v282_v48  ;;  %863 = vmatprep.mubr.f32.mxu1 %v2877_v0  ;;  %v299_v48 = vld [vmem:[#allocation8 + $0xb8] sm:$0xff] }
 0x1f9   :  { %2232 = vmatmul.mubr.msk.f32.vlgmr.msra.gmra.mxu0 %vm201_vm2, %v2601_v36  ;;  %2233 = vmatmul.mubr.msk.f32.vlgmr.msra.gmra.mxu1 %vm201_vm2, %v2601_v36 }
 0x1fa   :  { %894 = vmatprep.subr.mxu0 %v384_v49  ;;  %965 = vmatprep.subr.mxu1 %v386_v50  ;;  %v296_v49 = vld [vmem:[#allocation8 + $0xa0] sm:$0xff]  ;;  %v298_v50 = vld [vmem:[#allocation8 + $0xb0] sm:$0xff] }
 0x1fb   :  { %895 = vmatpush1.msra.mxu0 %v383_v51  ;;  %966 = vmatpush1.msra.mxu1 %v385_v52  ;;  %v400_v51 = vld [vmem:[#allocation8 + $0x3e0] sm:$0xff]  ;;  %v402_v52 = vld [vmem:[#allocation8 + $0x3f0] sm:$0xff] }
 0x1fc   :  { %896 = vmatprep.subr.mxu0 %v351_v53  ;;  %967 = vmatprep.subr.mxu1 %v353_v54  ;;  %v399_v53 = vld [vmem:[#allocation8 + $0x3d8] sm:$0xff]  ;;  %v401_v54 = vld [vmem:[#allocation8 + $0x3e8] sm:$0xff] }
 0x1fd   :  { %897 = vmatpush1.msra.mxu0 %v350_v55  ;;  %968 = vmatpush1.msra.mxu1 %v352_v56  ;;  %v367_v55 = vld [vmem:[#allocation8 + $0x2d8] sm:$0xff]  ;;  %v369_v56 = vld [vmem:[#allocation8 + $0x2e8] sm:$0xff] }
 0x1fe   :  { %898 = vmatprep.subr.mxu0 %v318_v57  ;;  %969 = vmatprep.subr.mxu1 %v320_v58  ;;  %v366_v57 = vld [vmem:[#allocation8 + $0x2d0] sm:$0xff]  ;;  %v368_v58 = vld [vmem:[#allocation8 + $0x2e0] sm:$0xff] }
 0x1ff   :  { %899 = vmatpush1.msra.mxu0 %v317_v59  ;;  %970 = vmatpush1.msra.mxu1 %v319_v60  ;;  %v334_v59 = vld [vmem:[#allocation8 + $0x1d0] sm:$0xff]  ;;  %v336_v60 = vld [vmem:[#allocation8 + $0x1e0] sm:$0xff] }
 0x200   :  { %900 = vmatprep.subr.mxu0 %v285_v61  ;;  %971 = vmatprep.subr.mxu1 %v287_v62  ;;  %v333_v61 = vld [vmem:[#allocation8 + $0x1c8] sm:$0xff]  ;;  %v335_v62 = vld [vmem:[#allocation8 + $0x1d8] sm:$0xff] }
 0x201   :  { %901 = vmatpush1.msra.mxu0 %v284_v63  ;;  %934 = vmatprep.mubr.f32.mxu0 %v2877_v0  ;;  %v301_v63 = vld [vmem:[#allocation8 + $0xc8] sm:$0xff] }
 0x202   :  { %972 = vmatpush1.msra.mxu1 %v286_v1  ;;  %1005 = vmatprep.mubr.f32.mxu1 %v2877_v0  ;;  %v303_v1 = vld [vmem:[#allocation8 + $0xd8] sm:$0xff] }
 0x203   :  { %2234 = vmatmul.mubr.msk.f32.vlgmr.msra.gmra.mxu0 %vm201_vm2, %v2601_v36  ;;  %2235 = vmatmul.mubr.msk.f32.vlgmr.msra.gmra.mxu1 %vm201_vm2, %v2601_v36 }
 0x204   :  { %1036 = vmatprep.subr.mxu0 %v388_v2  ;;  %1107 = vmatprep.subr.mxu1 %v390_v3  ;;  %v300_v2 = vld [vmem:[#allocation8 + $0xc0] sm:$0xff]  ;;  %v302_v3 = vld [vmem:[#allocation8 + $0xd0] sm:$0xff] }
 0x205   :  { %1037 = vmatpush1.msra.mxu0 %v387_v4  ;;  %1108 = vmatpush1.msra.mxu1 %v389_v5  ;;  %v404_v4 = vld [vmem:[#allocation8 + $0x400] sm:$0xff]  ;;  %v406_v5 = vld [vmem:[#allocation8 + $0x410] sm:$0xff] }
 0x206   :  { %1038 = vmatprep.subr.mxu0 %v355_v6  ;;  %1109 = vmatprep.subr.mxu1 %v357_v7  ;;  %v403_v6 = vld [vmem:[#allocation8 + $0x3f8] sm:$0xff]  ;;  %v405_v7 = vld [vmem:[#allocation8 + $0x408] sm:$0xff] }
 0x207   :  { %1039 = vmatpush1.msra.mxu0 %v354_v8  ;;  %1110 = vmatpush1.msra.mxu1 %v356_v9  ;;  %v371_v8 = vld [vmem:[#allocation8 + $0x2f8] sm:$0xff]  ;;  %v373_v9 = vld [vmem:[#allocation8 + $0x308] sm:$0xff] }
 0x208   :  { %1040 = vmatprep.subr.mxu0 %v322_v10  ;;  %1111 = vmatprep.subr.mxu1 %v324_v11  ;;  %v370_v10 = vld [vmem:[#allocation8 + $0x2f0] sm:$0xff]  ;;  %v372_v11 = vld [vmem:[#allocation8 + $0x300] sm:$0xff] }
 0x209   :  { %1041 = vmatpush1.msra.mxu0 %v321_v12  ;;  %1112 = vmatpush1.msra.mxu1 %v323_v13  ;;  %v338_v12 = vld [vmem:[#allocation8 + $0x1f0] sm:$0xff]  ;;  %v340_v13 = vld [vmem:[#allocation8 + $0x200] sm:$0xff] }
 0x20a   :  { %1042 = vmatprep.subr.mxu0 %v289_v14  ;;  %1113 = vmatprep.subr.mxu1 %v291_v15  ;;  %v337_v14 = vld [vmem:[#allocation8 + $0x1e8] sm:$0xff]  ;;  %v339_v15 = vld [vmem:[#allocation8 + $0x1f8] sm:$0xff] }
 0x20b   :  { %1043 = vmatpush1.msra.mxu0 %v288_v16  ;;  %1076 = vmatprep.mubr.f32.mxu0 %v2877_v0  ;;  %v305_v16 = vld [vmem:[#allocation8 + $0xe8] sm:$0xff] }
 0x20c   :  { %1114 = vmatpush1.msra.mxu1 %v290_v17  ;;  %1147 = vmatprep.mubr.f32.mxu1 %v2877_v0  ;;  %v307_v17 = vld [vmem:[#allocation8 + $0xf8] sm:$0xff] }
 0x20d   :  { %2236 = vmatmul.mubr.msk.f32.vlgmr.msra.gmra.mxu0 %vm201_vm2, %v2601_v36  ;;  %2237 = vmatmul.mubr.msk.f32.vlgmr.msra.gmra.mxu1 %vm201_vm2, %v2601_v36 }
 0x20e   :  { %1178 = vmatprep.subr.mxu0 %v392_v18  ;;  %1249 = vmatprep.subr.mxu1 %v394_v19  ;;  %v304_v18 = vld [vmem:[#allocation8 + $0xe0] sm:$0xff]  ;;  %v306_v19 = vld [vmem:[#allocation8 + $0xf0] sm:$0xff] }
 0x20f   :  { %1179 = vmatpush1.msra.mxu0 %v391_v20  ;;  %1250 = vmatpush1.msra.mxu1 %v393_v21  ;;  %v407_v20 = vld [vmem:[#allocation8 + $0x418] sm:$0xff]  ;;  %v374_v21 = vld [vmem:[#allocation8 + $0x310] sm:$0xff] }
 0x210   :  { %1180 = vmatprep.subr.mxu0 %v359_v22  ;;  %1251 = vmatprep.subr.mxu1 %v361_v23  ;;  %v341_v22 = vld [vmem:[#allocation8 + $0x208] sm:$0xff]  ;;  %v308_v23 = vld [vmem:[#allocation8 + $0x100] sm:$0xff] }
 0x211   :  { %1181 = vmatpush1.msra.mxu0 %v358_v24  ;;  %1252 = vmatpush1.msra.mxu1 %v360_v25 }
 0x212   :  { %1182 = vmatprep.subr.mxu0 %v326_v26  ;;  %1253 = vmatprep.subr.mxu1 %v328_v27 }
 0x213   :  { %1183 = vmatpush1.msra.mxu0 %v325_v28  ;;  %1254 = vmatpush1.msra.mxu1 %v327_v29 }
 0x214   :  { %1184 = vmatprep.subr.mxu0 %v293_v30  ;;  %1255 = vmatprep.subr.mxu1 %v295_v31 }
 0x215   :  { %1185 = vmatpush1.msra.mxu0 %v292_v32  ;;  %1218 = vmatprep.mubr.f32.mxu0 %v2877_v0 }
 0x216   :  { %1256 = vmatpush1.msra.mxu1 %v294_v33  ;;  %1289 = vmatprep.mubr.f32.mxu1 %v2877_v0 }
 0x217   :  { %2238 = vmatmul.mubr.msk.f32.vlgmr.msra.gmra.mxu0 %vm201_vm2, %v2601_v36  ;;  %2239 = vmatmul.mubr.msk.f32.vlgmr.msra.gmra.mxu1 %vm201_vm2, %v2601_v36 }
 0x218   :  { %1320 = vmatprep.subr.mxu0 %v396_v34  ;;  %1391 = vmatprep.subr.mxu1 %v398_v35  ;;  %v418_v35 = vlaneseq }
 0x219   :  { %1321 = vmatpush1.msra.mxu0 %v395_v37  ;;  %1392 = vmatpush1.msra.mxu1 %v397_v38 }
 0x21a   :  { %1322 = vmatprep.subr.mxu0 %v363_v39  ;;  %1393 = vmatprep.subr.mxu1 %v365_v40  ;;  %v2691_v39 = vshrl.u32 %v418_v35, 7 }
 0x21b   :  { %1323 = vmatpush1.msra.mxu0 %v362_v41  ;;  %1394 = vmatpush1.msra.mxu1 %v364_v42  ;;  %v2510_v42 = vmov 1983009808  }
 0x21c   :  { %1324 = vmatprep.subr.mxu0 %v330_v43  ;;  %1395 = vmatprep.subr.mxu1 %v332_v44  ;;  %2889 = vst [vmem:[#allocation23_spill] sm:$0xff] %v2691_v39  ;;  %v1794_v43 = vunpack.c.l.s4 %v2510_v42 }
 0x21d   :  { %1325 = vmatpush1.msra.mxu0 %v329_v45  ;;  %1396 = vmatpush1.msra.mxu1 %v331_v46  ;;  %v2702_v46 = vsub.s32 0, %v2691_v39 }
 0x21e   :  { %1326 = vmatprep.subr.mxu0 %v297_v47  ;;  %1397 = vmatprep.subr.mxu1 %v299_v48  ;;  %v2705_v47 = vsub.s32 2, %v2691_v39  ;;  %v2708_v48 = vsub.s32 1, %v2691_v39 }
 0x21f   :  { %1327 = vmatpush1.msra.mxu0 %v296_v49  ;;  %1360 = vmatprep.mubr.f32.mxu0 %v2877_v0  ;;  %2891 = vst [vmem:[#allocation25_spill] sm:$0xff] %v2702_v46  ;;  %v2711_v49 = vsub.s32 3, %v2691_v39 }
 0x220   :  { %1398 = vmatpush1.msra.mxu1 %v298_v50  ;;  %1431 = vmatprep.mubr.f32.mxu1 %v2877_v0  ;;  %v2713_v50 = vld [vmem:[#allocation10] sm:$0xff] }
 0x221   :  { %2240 = vmatmul.mubr.msk.f32.vlgmr.msra.gmra.mxu0 %vm201_vm2, %v2601_v36  ;;  %2241 = vmatmul.mubr.msk.f32.vlgmr.msra.gmra.mxu1 %vm201_vm2, %v2601_v36 }
 0x222   :  { %1462 = vmatprep.subr.mxu0 %v400_v51  ;;  %1533 = vmatprep.subr.mxu1 %v402_v52  ;;  %v1795_v51 = vunpack.c.0.s8 %v1794_v43  ;;  %v2511_v52 = vmov 1934713408  }
 0x223   :  { %1463 = vmatpush1.msra.mxu0 %v399_v53  ;;  %1534 = vmatpush1.msra.mxu1 %v401_v54  ;;  %v2715_v53 = vunpack.c.l.s4 %v2511_v52  ;;  %v2718_v54 = vsub.s32 4, %v2691_v39 }
 0x224   :  { %1464 = vmatprep.subr.mxu0 %v367_v55  ;;  %1535 = vmatprep.subr.mxu1 %v369_v56  ;;  %v2721_v55 = vsub.s32 6, %v2691_v39  ;;  %v2724_v56 = vsub.s32 5, %v2691_v39 }
 0x225   :  { %1465 = vmatpush1.msra.mxu0 %v366_v57  ;;  %1536 = vmatpush1.msra.mxu1 %v368_v58  ;;  %2892 = vst [vmem:[#allocation26_spill] sm:$0xff] %v2715_v53  ;;  %v2727_v57 = vsub.s32 7, %v2691_v39 }
 0x226   :  { %1466 = vmatprep.subr.mxu0 %v334_v59  ;;  %1537 = vmatprep.subr.mxu1 %v336_v60  ;;  %v2733_v60 = vld [vmem:[#allocation10 + $0x8] sm:$0xff] }
 0x227   :  { %1467 = vmatpush1.msra.mxu0 %v333_v61  ;;  %1538 = vmatpush1.msra.mxu1 %v335_v62  ;;  %v421_v61 = vrot.slane %v2713_v50, %v2702_v46  ;;  %v429_v62 = vrot.slane %v2713_v50, %v2705_v47 }
 0x228   :  { %1468 = vmatprep.subr.mxu0 %v301_v63  ;;  %1539 = vmatprep.subr.mxu1 %v303_v1  ;;  %v425_v63 = vrot.slane %v2713_v50, %v2708_v48  ;;  %v433_v1 = vrot.slane %v2713_v50, %v2711_v49 }
 0x229   :  { %1469 = vmatpush1.msra.mxu0 %v300_v2  ;;  %1502 = vmatprep.mubr.f32.mxu0 %v2877_v0 }
 0x22a   :  { %1540 = vmatpush1.msra.mxu1 %v302_v3  ;;  %1573 = vmatprep.mubr.f32.mxu1 %v2877_v0 }
 0x22b   :  { %2242 = vmatmul.mubr.msk.f32.vlgmr.msra.gmra.mxu0 %vm201_vm2, %v2601_v36  ;;  %2243 = vmatmul.mubr.msk.f32.vlgmr.msra.gmra.mxu1 %vm201_vm2, %v2601_v36 }
 0x22c   :  { %1604 = vmatprep.subr.mxu0 %v404_v4  ;;  %1675 = vmatprep.subr.mxu1 %v406_v5  ;;  %v2744_v4 = vsub.s32 %v1795_v51, %v2691_v39 }
 0x22d   :  { %1605 = vmatpush1.msra.mxu0 %v403_v6  ;;  %1676 = vmatpush1.msra.mxu1 %v405_v7  ;;  %v437_v6 = vrot.slane %v2713_v50, %v2718_v54  ;;  %v445_v7 = vrot.slane %v2713_v50, %v2721_v55 }
 0x22e   :  { %1606 = vmatprep.subr.mxu0 %v371_v8  ;;  %1677 = vmatprep.subr.mxu1 %v373_v9  ;;  %2893 = vst [vmem:[#allocation27_spill] sm:$0xff] %v2744_v4  ;;  %v410_v8 = vld [vmem:[#allocation10 + $0x10] sm:$0xff]  ;;  %v441_v9 = vrot.slane %v2713_v50, %v2724_v56 }
 0x22f   :  { %1607 = vmatpush1.msra.mxu0 %v370_v10  ;;  %1678 = vmatpush1.msra.mxu1 %v372_v11  ;;  %v449_v10 = vrot.slane %v2713_v50, %v2727_v57  ;;  %v453_v11 = vrot.slane %v2733_v60, %v2702_v46  ;;  %v489_v43 = vrot.slane %v410_v8, %v2708_v48 }
 0x230   :  { %1608 = vmatprep.subr.mxu0 %v338_v12  ;;  %1679 = vmatprep.subr.mxu1 %v340_v13  ;;  %v461_v12 = vrot.slane %v2733_v60, %v2705_v47  ;;  %v457_v13 = vrot.slane %v2733_v60, %v2708_v48  ;;  %v497_v50 = vrot.slane %v410_v8, %v2711_v49 }
 0x231   :  { %1609 = vmatpush1.msra.mxu0 %v337_v14  ;;  %1680 = vmatpush1.msra.mxu1 %v339_v15  ;;  %v465_v14 = vrot.slane %v2733_v60, %v2711_v49  ;;  %v469_v15 = vrot.slane %v2733_v60, %v2718_v54  ;;  %v501_v51 = vrot.slane %v410_v8, %v2718_v54 }
 0x232   :  { %1610 = vmatprep.subr.mxu0 %v305_v16  ;;  %1681 = vmatprep.subr.mxu1 %v307_v17  ;;  %v477_v16 = vrot.slane %v2733_v60, %v2721_v55  ;;  %v473_v17 = vrot.slane %v2733_v60, %v2724_v56  ;;  %v509_v52 = vrot.slane %v410_v8, %v2721_v55 }
 0x233   :  { %1611 = vmatpush1.msra.mxu0 %v304_v18  ;;  %1644 = vmatprep.mubr.f32.mxu0 %v2877_v0  ;;  %v481_v18 = vrot.slane %v2733_v60, %v2727_v57  ;;  %v505_v60 = vrot.slane %v410_v8, %v2724_v56 }
 0x234   :  { %1682 = vmatpush1.msra.mxu1 %v306_v19  ;;  %1715 = vmatprep.mubr.f32.mxu1 %v2877_v0  ;;  %v485_v19 = vrot.slane %v410_v8, %v2702_v46 }
 0x235   :  { %2244 = vmatmul.mubr.msk.f32.vlgmr.msra.gmra.mxu0 %vm201_vm2, %v2601_v36  ;;  %2245 = vmatmul.mubr.msk.f32.vlgmr.msra.gmra.mxu1 %vm201_vm2, %v2601_v36 }
 0x236   :  { %2287 = vmatprep.subr.mxu0 %v2877_v0  ;;  %2295 = vmatprep.mubr.msk.f32.mxu0 %vm2509_vm0, %v2877_v0 }
 0x237   :  { %2288 = vmatpush3.msra.mxu0 %v407_v20  ;;  %2298 = vmatprep.subr.mxu1 %v2877_v0  ;;  %v493_v20 = vrot.slane %v410_v8, %v2705_v47 }
 0x238   :  { %2289 = vmatprep.subr.mxu0 %v2877_v0  ;;  %2306 = vmatprep.mubr.msk.f32.mxu1 %vm2509_vm0, %v2877_v0 }
 0x239   :  { %2290 = vmatpush3.msra.mxu0 %v374_v21 }
 0x23a   :  { %2291 = vmatprep.subr.mxu0 %v2877_v0 }
 0x23b   :  { %2292 = vmatpush3.msra.mxu0 %v341_v22 }
 0x23c   :  { %2293 = vmatprep.subr.mxu0 %v2877_v0 }
 0x23d   :  { %2294 = vmatpush3.msra.mxu0 %v308_v23  ;;  %v2773_v23 = vld [vmem:[#allocation10 + $0x18] sm:$0xff] }
 0x23e   :  { %2296 = vmatmul.mubr.msk.f32.vlgmr.msra.gmra.mxu0 %vm201_vm2, %v2601_v36  ;;  %2309 = vmatprep.subr.mxu0 %v2877_v0 }
 0x23f   :  { %2317 = vmatprep.mubr.msk.f32.mxu0 %vm2509_vm0, %v2877_v0  ;;  %v513_v0 = vrot.slane %v410_v8, %v2727_v57  ;;  %v541_v8 = vrot.slane %v2773_v23, %v2721_v55 }
 0x2b0   :  { %v2663_v24 = vpop.f32.mrf.mxu0  ;;  %v2665_v25 = vpop.f32.mrf.mxu1 }
 0x2b1   :  { %v2776_v35 = vadd.f32 %v2663_v24, %v421_v61  ;;  %v2779_v42 = vadd.f32 %v2665_v25, %v429_v62  ;;  %v517_v24 = vrot.slane %v2773_v23, %v2702_v46  ;;  %v525_v25 = vrot.slane %v2773_v23, %v2705_v47 }
 0x2b2   :  { %v2667_v26 = vpop.f32.mrf.mxu0  ;;  %v2669_v27 = vpop.f32.mrf.mxu1  ;;  %v521_v61 = vrot.slane %v2773_v23, %v2708_v48  ;;  %v529_v62 = vrot.slane %v2773_v23, %v2711_v49  ;;  %v537_v46 = vrot.slane %v2773_v23, %v2724_v56  ;;  %v545_v47 = vrot.slane %v2773_v23, %v2727_v57 }
 0x2b3   :  { %v2809_v49 = vadd.f32 %v2669_v27, %v433_v1 }
 0x2b9   :  { %v2671_v28 = vpop.f32.mrf.mxu0  ;;  %v2673_v29 = vpop.f32.mrf.mxu1 }
 0x2ba   :  { %2885 = vst [vmem:[#allocation19_spill] sm:$0xff] %v2671_v28  ;;  %2886 = vst [vmem:[#allocation20_spill] sm:$0xff] %v2673_v29 }
 0x2bb   :  { %v2675_v30 = vpop.f32.mrf.mxu0  ;;  %v2677_v36 = vpop.f32.mrf.mxu1 }
 0x2bc   :  { %v868_v29 = vadd.f32 %v2677_v36, %v449_v10 }
 0x2c3   :  { %v2679_v31 = vpop.f32.mrf.mxu0  ;;  %v2681_v32 = vpop.f32.mrf.mxu1 }
 0x2c4   :  { %2887 = vst [vmem:[#allocation21_spill] sm:$0xff] %v2679_v31  ;;  %2888 = vst [vmem:[#allocation22_spill] sm:$0xff] %v2681_v32  ;;  %v533_v32 = vrot.slane %v2773_v23, %v2718_v54  ;;  %v2806_v31 = vadd.f32 %v2667_v26, %v425_v63  ;;  %v797_v54 = vadd.f32 %v2675_v30, %v441_v9 }
 0x2c5   :  { %v2683_v33 = vpop.f32.mrf.mxu0  ;;  %v2685_v34 = vpop.f32.mrf.mxu1 }
 0x2c6   :  { %v939_v55 = vadd.f32 %v2683_v33, %v457_v13 }
 0x2cd   :  { %v2687_v37 = vpop.f32.mrf.mxu0  ;;  %v2689_v38 = vpop.f32.mrf.mxu1 }
 0x2ce   :  { %v1079_v57 = vadd.f32 %v2687_v37, %v469_v15 }
 0x2cf   :  { %v2693_v40 = vpop.f32.mrf.mxu0  ;;  %v2695_v41 = vpop.f32.mrf.mxu1 }
 0x2d0   :  { %v1081_v26 = vadd.f32 %v2693_v40, %v473_v17  ;;  %v1152_v63 = vadd.f32 %v2695_v41, %v481_v18  ;;  %v2896_v40 = vld [vmem:[#allocation20_spill] sm:$0xff]  ;;  %v1816_v41 = vcombine.low %v797_v54, %v868_v29 }
 0x2d7   :  { %v2697_v44 = vpop.f32.mrf.mxu0  ;;  %v2699_v45 = vpop.f32.mrf.mxu1 }
 0x2d8   :  { %2890 = vst [vmem:[#allocation24_spill] sm:$0xff] %v2699_v45  ;;  %v1010_v45 = vadd.f32 %v2685_v34, %v465_v14  ;;  %v1221_v34 = vadd.f32 %v2697_v44, %v485_v19  ;;  %v866_v14 = vadd.f32 %v2896_v40, %v445_v7 }
 0x2d9   :  { %v2729_v58 = vpop.f32.mrf.mxu0  ;;  %v2731_v59 = vpop.f32.mrf.mxu1 }
 0x2da   :  { %v1223_v27 = vadd.f32 %v2729_v58, %v489_v43  ;;  %v1294_v30 = vadd.f32 %v2731_v59, %v497_v50  ;;  %v2897_v58 = vld [vmem:[#allocation21_spill] sm:$0xff]  ;;  %v2898_v59 = vld [vmem:[#allocation22_spill] sm:$0xff] }
 0x2db   :  { %v937_v17 = vadd.f32 %v2897_v58, %v453_v11 }
 0x2df   :  { %v2894_v10 = vld [vmem:[#allocation24_spill] sm:$0xff] }
 0x2e0   :  { %v1292_v37 = vadd.f32 %v2894_v10, %v493_v20  ;;  %v1850_v20 = vcombine.low %v939_v55, %v1010_v45 }
 0x2e1   :  { %v1362_v2 = vpop.f32.mrf.mxu0  ;;  %v1433_v3 = vpop.f32.mrf.mxu1 }
 0x2e2   :  { %v1363_v1 = vadd.f32 %v1362_v2, %v501_v51  ;;  %v1434_v36 = vadd.f32 %v1433_v3, %v509_v52  ;;  %v1008_v2 = vadd.f32 %v2898_v59, %v461_v12  ;;  %v1866_v3 = vcombine.low %v1081_v26, %v1152_v63 }
 0x2e3   :  { %v1364_v21 = vpop.f32.mrf.mxu0  ;;  %v1435_v22 = vpop.f32.mrf.mxu1  ;;  %v1800_v51 = vcombine.low %v2806_v31, %v2809_v49 }
 0x2e4   :  { %v1365_v28 = vadd.f32 %v1364_v21, %v505_v60  ;;  %v1436_v56 = vadd.f32 %v1435_v22, %v513_v0  ;;  %v1150_v0 = vadd.f32 %v2689_v38, %v477_v16  ;;  %v1908_v38 = vcombine.low %v1363_v1, %v1434_v36 }
 0x2e5   :  { %v1892_v21 = vcombine.low %v1221_v34, %v1292_v37  ;;  %v1842_v60 = vcombine.low %v937_v17, %v1008_v2 }
 0x2eb   :  { %v1504_v5 = vpop.f32.mrf.mxu0  ;;  %v1575_v53 = vpop.f32.mrf.mxu1 }
 0x2ec   :  { %v1505_v9 = vadd.f32 %v1504_v5, %v517_v24  ;;  %v1576_v33 = vadd.f32 %v1575_v53, %v525_v25  ;;  %v1900_v5 = vcombine.low %v1223_v27, %v1294_v30 }
 0x2ed   :  { %v1506_v39 = vpop.f32.mrf.mxu0  ;;  %v1577_v4 = vpop.f32.mrf.mxu1 }
 0x2ee   :  { %v1507_v23 = vadd.f32 %v1506_v39, %v521_v61  ;;  %v1578_v48 = vadd.f32 %v1577_v4, %v529_v62  ;;  %v1916_v39 = vcombine.low %v1365_v28, %v1436_v56  ;;  %v2895_v4 = vld [vmem:[#allocation19_spill] sm:$0xff]  ;;  %v1942_v16 = vcombine.low %v1505_v9, %v1576_v33 }
 0x2ef   :  { %v795_v13 = vadd.f32 %v2895_v4, %v437_v6  ;;  %v1858_v28 = vcombine.low %v1079_v57, %v1150_v0  ;;  %v2899_v6 = vld [vmem:[#allocation27_spill] sm:$0xff]  ;;  %v2901_v57 = vld [vmem:[#allocation26_spill] sm:$0xff]  ;;  %v2903_v33 = vcombine.low %v2776_v35, %v2779_v42 }
 0x2f0   :  { %v1950_v15 = vcombine.low %v1507_v23, %v1578_v48  ;;  %v1923_v22 = vrot.slane %v1916_v39, %v2899_v6  ;;  %v1907_v45 = vrot.slane %v1900_v5, %v2899_v6  ;;  %v1915_v24 = vrot.slane %v1908_v38, %v2899_v6  ;;  %v2900_v56 = vld [vmem:[#allocation23_spill] sm:$0xff] }
 0x2f1   :  { %v1808_v52 = vcombine.low %v795_v13, %v866_v14  ;;  %v1949_v25 = vrot.slane %v1942_v16, %v2899_v6  ;;  %v1823_v62 = vrot.slane %v1816_v41, %v2899_v6  ;;  %v1807_v55 = vrot.slane %v1800_v51, %v2899_v6  ;;  %v1992_v16 = vld [vmem:[#allocation11] sm:$0xff] }
 0x2f2   :  { %v1957_v43 = vrot.slane %v1950_v15, %v2899_v6  ;;  %v1932_v31 = vcombine.low %v1915_v24, %v1923_v22  ;;  %v2902_v23 = vunpack.c.0.s8 %v2901_v57  ;;  %v1849_v27 = vrot.slane %v1842_v60, %v2899_v6 }
 0x2f3   :  { %v1815_v63 = vrot.slane %v1808_v52, %v2899_v6  ;;  %v1799_v0 = vrot.slane %v2903_v33, %v2899_v6  ;;  %v2904_v5 = vmov 0.0  }
 0x2f4   :  { %v1974_v48 = vcombine.low %v1949_v25, %v1957_v43  ;;  %v1830_v26 = vsub.s32 %v2902_v23, %v2900_v56 }
 0x2f5   :  { %v1646_v53 = vpop.f32.mrf.mxu0  ;;  %v1717_v18 = vpop.f32.mrf.mxu1  ;;  %v1832_v34 = vcombine.low %v1815_v63, %v1823_v62  ;;  %v1824_v40 = vcombine.low %v1799_v0, %v1807_v55 }
 0x2f6   :  { %v1647_v44 = vadd.f32 %v1646_v53, %v533_v32  ;;  %v1718_v19 = vadd.f32 %v1717_v18, %v541_v8  ;;  %v1873_v32 = vrot.slane %v1866_v3, %v2899_v6  ;;  %v1857_v8 = vrot.slane %v1850_v20, %v2899_v6 }
 0x2f7   :  { %v1648_v7 = vpop.f32.mrf.mxu0  ;;  %v1719_v29 = vpop.f32.mrf.mxu1  ;;  %v1939_v37 = vrot.slane %v1932_v31, %v1830_v26  ;;  %v1981_v39 = vrot.slane %v1974_v48, %v1830_v26  ;;  %v1839_v17 = vrot.slane %v1832_v34, %v1830_v26  ;;  %v1831_v35 = vrot.slane %v1824_v40, %v1830_v26 }
 0x2f8   :  { %v1958_v11 = vcombine.low %v1647_v44, %v1718_v19  ;;  %v1649_v50 = vadd.f32 %v1648_v7, %v537_v46  ;;  %v1720_v12 = vadd.f32 %v1719_v29, %v545_v47  ;;  %v1865_v46 = vrot.slane %v1858_v28, %v2899_v6  ;;  %v1993_v44 = vld [vmem:[#allocation11 + $0x8] sm:$0xff] }
 0x2f9   :  { %v1899_v47 = vrot.slane %v1892_v21, %v2899_v6  ;;  %v1874_v10 = vcombine.low %v1849_v27, %v1857_v8  ;;  %v1840_v18 = vcombine.low %v1831_v35, %v1839_v17  ;;  %v1841_v38 = vcombine.high %v1831_v35, %v1839_v17  ;;  %v2229_v21 = vld [vmem:[#allocation10 + $0x20] ss:$0 sm:$0xff] }
 0x2fa   :  { %v1966_v61 = vcombine.low %v1649_v50, %v1720_v12  ;;  %v1965_v49 = vrot.slane %v1958_v11, %v2899_v6  ;;  %v1882_v30 = vcombine.low %v1865_v46, %v1873_v32  ;;  %v2512_v19 = vmov 1966171168   ;;  %v2905_v50 = vld [vmem:[#allocation25_spill] sm:$0xff] }
 0x2fb   :  { %v1924_v1 = vcombine.low %v1899_v47, %v1907_v45  ;;  %v1881_v59 = vrot.slane %v1874_v10, %v1830_v26  ;;  %v1996_v20 = vunpack.c.l.s4 %v2512_v19 }
 0x2fc   :  { %v1973_v54 = vrot.slane %v1966_v61, %v2899_v6  ;;  %v1889_v14 = vrot.slane %v1882_v30, %v1830_v26 }
 0x2fd   :  { %v1931_v41 = vrot.slane %v1924_v1, %v1830_v26  ;;  %v1997_v28 = vunpack.c.0.s8 %v1996_v20 }
 0x2fe   :  { %v1982_v36 = vcombine.low %v1965_v49, %v1973_v54  ;;  %v1788_v9 = vpop.f32.mrf.mxu0  ;;  %v1890_v42 = vcombine.low %v1881_v59, %v1889_v14  ;;  %v1891_v53 = vcombine.high %v1881_v59, %v1889_v14 }
 0x2ff   :  { %v1940_v2 = vcombine.low %v1931_v41, %v1939_v37  ;;  %v1941_v3 = vcombine.high %v1931_v41, %v1939_v37  ;;  %v1789_v6 = vadd.f32 %v2229_v21, %v1788_v9  ;;  %v2000_v22 = vsub.s32 %v1997_v28, %v2900_v56 }
 0x300   :  { %v1989_v4 = vrot.slane %v1982_v36, %v1830_v26  ;;  %v2297_v13 = vpop.f32.mrf.mxu0 }
 0x301   :  { %v2001_v7 = vrot.slane %v1789_v6, %v2000_v22 }
 0x302   :  { %v1990_v15 = vcombine.low %v1981_v39, %v1989_v4  ;;  %v1991_v58 = vcombine.high %v1981_v39, %v1989_v4 }
 0x303   :  { %v2002_v29 = vcombine.high %v2001_v7, %v2001_v7  ;;  %v2009_v43 = vrot.slane %v2001_v7, %v2000_v22 }
 0x304   :  { %2299 = vmatpush3.msra.mxu1 %v1990_v15  ;;  %2310 = vmatpush3.msra.mxu0 %v1991_v58 }
 0x305   :  { %2300 = vmatprep.subr.mxu1 %v2904_v5  ;;  %2311 = vmatprep.subr.mxu0 %v2904_v5  ;;  %v2016_v11 = vrot.slane %v2002_v29, %v2000_v22  ;;  %v2020_v12 = vrot.slane %v2009_v43, %v2905_v50 }
 0x306   :  { %2301 = vmatpush3.msra.mxu1 %v1940_v2  ;;  %2312 = vmatpush3.msra.mxu0 %v1941_v3 }
 0x307   :  { %2302 = vmatprep.subr.mxu1 %v2904_v5  ;;  %2313 = vmatprep.subr.mxu0 %v2904_v5  ;;  %v2024_v32 = vrot.slane %v2016_v11, %v2905_v50 }
 0x308   :  { %2303 = vmatpush3.msra.mxu1 %v1890_v42  ;;  %2314 = vmatpush3.msra.mxu0 %v1891_v53 }
 0x309   :  { %2304 = vmatprep.subr.mxu1 %v2904_v5  ;;  %2315 = vmatprep.subr.mxu0 %v2904_v5 }
 0x30a   :  { %2305 = vmatpush3.msra.mxu1 %v1840_v18  ;;  %2316 = vmatpush3.msra.mxu0 %v1841_v38 }
 0x30b   :  { %2307 = vmatmul.mubr.msk.f32.vlgmr.msra.gmra.mxu1 %vm201_vm2, %v1992_v16  ;;  %2318 = vmatmul.mubr.msk.f32.vlgmr.msra.gmra.mxu0 %vm201_vm2, %v1993_v44 }
 0x3cb   :  { %v2096_v51 = vpop.f32.mrf.mxu1  ;;  %v2169_v52 = vpop.f32.mrf.mxu0 }
 0x3cc   :  { %v2097_v60 = vadd.f32 %v2096_v51, %v2020_v12  ;;  %v2170_v25 = vadd.f32 %v2169_v52, %v2024_v32 }
 0x3cd   :  { %v2308_v45 = vpop.f32.mrf.mxu1  ;;  %v2319_v24 = vpop.f32.mrf.mxu0 }
 0x3ce   :  { %2173 = vadd.xlane.f32.xlu0 %v2097_v60  ;;  %v2177_v61 = vmul.f32 %v2097_v60, %v2097_v60  ;;  %v2178_v62 = vmul.f32 %v2170_v25, %v2170_v25 }
 0x3d0   :  { %2179 = vadd.xlane.f32.xlu1 %v2177_v61 }
 0x3d2   :  { %2175 = vadd.xlane.f32.xlu0 %v2170_v25 }
 0x3d4   :  { %2181 = vadd.xlane.f32.xlu1 %v2178_v62 }
 0x457   :  { %v2174_v8 = vpop.xlane.xlu0 %2173 }
 0x458   :  { %v2183_v46 = vmul.f32 0.03125, %v2174_v8 }
 0x459   :  { %v2180_v47 = vpop.xlane.xlu1 %2179 }
 0x45a   :  { %v2187_v31 = vmul.f32 %v2183_v46, %v2183_v46  ;;  %v2185_v48 = vmul.f32 0.03125, %v2180_v47  ;;  %v2193_v36 = vsub.f32 %v2097_v60, %v2183_v46 }
 0x45b   :  { %v2176_v49 = vpop.xlane.xlu0 %2175 }
 0x45c   :  { %v2189_v54 = vsub.f32 %v2185_v48, %v2187_v31  ;;  %v2184_v55 = vmul.f32 0.03125, %v2176_v49 }
 0x45d   :  { %v2182_v56 = vpop.xlane.xlu1 %2181 }
 0x45e   :  { %v2191_v57 = vmax.f32 %v2189_v54, 0.0  ;;  %v2188_v23 = vmul.f32 %v2184_v55, %v2184_v55  ;;  %v2186_v26 = vmul.f32 0.03125, %v2182_v56  ;;  %v2194_v0 = vsub.f32 %v2170_v25, %v2184_v55 }
 0x460   :  { %v2195_v63 = vadd.f32 1e-05, %v2191_v57  ;;  %v2190_v27 = vsub.f32 %v2186_v26, %v2188_v23 }
 0x462   :  { %2340 = vrsqrt.f32 %v2195_v63  ;;  %v2192_v30 = vmax.f32 %v2190_v27, 0.0 }
 0x464   :  { %v2196_v1 = vadd.f32 1e-05, %v2192_v30 }
 0x466   :  { %2342 = vrsqrt.f32 %v2196_v1 }
 0x46f   :  { %v2341_v9 = vpop.eup %2340 }
 0x470   :  { %v2199_v33 = vmul.f32 %v2341_v9, %v2193_v36 }
 0x472   :  { %2344 = vtanh.f32 %v2199_v33 }
 0x473   :  { %v2343_v34 = vpop.eup %2342 }
 0x474   :  { %v2200_v10 = vmul.f32 %v2343_v34, %v2194_v0 }
 0x476   :  { %2346 = vtanh.f32 %v2200_v10 }
 0x47f   :  { %v2345_v37 = vpop.eup %2344 }
 0x480   :  { %2203 = vst [vmem:[#allocation13] sm:$0xff] %v2345_v37 }
 0x483   :  { %v2347_v39 = vpop.eup %2346 }
 0x484   :  { %2204 = vst [vmem:[#allocation13 + $0x8] sm:$0xff] %v2347_v39 }
 0x485   :  { %2479 = shalt.err (!%p2476_p6)
}
 0x486   :  { %2216 = dma.vmem_to_hbm [thread:$0]  %s2211_s15, 256, %s2876_s8, [#allocation4], %s2504_s3, %s2504_s3, %s2505_s24  }
 0x487   :  { %2496 = dma.done.wait [#allocation4], 256  }
 0x488   :  { %2497 = vsyncadd [#allocation4], 4294967040 }
 0x489   :  { %2220 = vsyncpa [#allocation3], 1 }
 0x48a   :  { %2221 = vsyncpa [#allocation6], 1 }
 0x48b   :  { %2222 = vsyncpa [#allocation9], 1 }
 0x48c   :  { %2223 = vsyncpa [#allocation12], 1 }
 0x48d   :  { %2224 = vsyncpa [#allocation4], 1 }

</bundles_post_ra>
